<compile_context>
chip_gen: v6e
topology: v6e:2x2x1
jax: 0.10.0
libtpu: 0.0.40
codegen_flags: <defaults>
</compile_context>

<pallas_src>
import math

import jax
import jax.numpy as jnp
from jax.experimental import pallas as pl
from jax.experimental.pallas import tpu as pltpu

_INV_SQRT2 = 1.0 / math.sqrt(2.0)


def _gelu(x):
    # exact (erf-based) GELU, matching torch.nn.GELU() default
    return 0.5 * x * (1.0 + jax.lax.erf(x * _INV_SQRT2))


def _store_center(pad_ref, value, pad_top):
    # Write `value` into the centre rows of a padded VMEM scratch buffer.
    # The zero halo rows were initialised once on the first grid step.
    rows = value.shape[0]
    pad_ref[pad_top:pad_top + rows, :] = value


def _conv_same(pad_ref, w_ref, K, L):
    # 'same' 1-D conv along the row (time) axis, channels-last:
    #   pad_ref : (L + K - 1, Cin) zero-padded activations (VMEM scratch)
    #   w_ref   : (K, Cin, Cout)   taps (BN scale already folded in)
    # Returns the (L, Cout) f32 pre-activation (no bias/shift).
    xp = pad_ref[...]
    Cin = xp.shape[1]
    acc = None
    for j in range(K):                                   # static, unrolled
        xs = xp[j:j + L, :]                              # (L, Cin)
        if Cin == 1:
            term = xs * w_ref[j]                         # (L,1)*(1,Cout)
        else:
            term = jnp.dot(xs, w_ref[j],
                           preferred_element_type=jnp.float32)
        acc = term if acc is None else acc + term
    return acc


# ---------------------------------------------------------------------------
# Fused forward kernel (one batch element per grid step)
# ---------------------------------------------------------------------------
def _fused_tsencoder_kernel(
        x_ref,
        w0_ref, s0_ref, w3_ref, s3_ref, w1_ref, s1_ref, w2_ref, s2_ref,
        wc1_ref, bc1_ref, wc2_ref, bc2_ref, wh_ref, bh_ref,
        o_ref,
        pin_ref, pa_ref, pb_ref, pc1_ref, t1_ref, pc2_ref, t2_ref):
    L = x_ref.shape[1]
    L2, L4 = L // 2, L // 4

    # ---- zero the padding halos once (scratch persists across grid steps) ---
    @pl.when(pl.program_id(0) == 0)
    def _():
        pin_ref[...] = jnp.zeros_like(pin_ref)
        pa_ref[...] = jnp.zeros_like(pa_ref)
        pb_ref[...] = jnp.zeros_like(pb_ref)
        pc1_ref[...] = jnp.zeros_like(pc1_ref)
        pc2_ref[...] = jnp.zeros_like(pc2_ref)

    # ---- embed_layer: Conv2d(1, 32, [1,8], 'same') + BN + GELU --------------
    _store_center(pin_ref, x_ref[0], 3)                          # (L+7, 1)
    h = _gelu(_conv_same(pin_ref, w0_ref, 8, L) + s0_ref[...])   # (L, 32)
    # mamba: MMMLayer(32, 32) -> identity (see TODO above)

    # ---- embed_layer3: Conv2d(32, 64, [1,8], 'same') + BN + GELU ------------
    _store_center(pa_ref, h, 3)
    h = _gelu(_conv_same(pa_ref, w3_ref, 8, L) + s3_ref[...])    # (L, 64)
    # mamba3 -> identity

    # ---- embed_layer1: Conv2d(64, 32, [1,8], 'same') + BN + GELU ------------
    _store_center(pb_ref, h, 3)
    h = _gelu(_conv_same(pb_ref, w1_ref, 8, L) + s1_ref[...])    # (L, 32)
    # mamba1 -> identity

    # ---- embed_layer2: Conv2d(32, 32, [1,1]) + BN + GELU (then squeeze) -----
    h = _gelu(jnp.dot(h, w2_ref[...],
                      preferred_element_type=jnp.float32) + s2_ref[...])
    # mamba2 -> identity                                          # (L, 32)

    # ---- conv1 (k=3, pad=1) -> MaxPool1d(2,2) -> GELU -----------------------
    _store_center(pc1_ref, h, 1)
    t1_ref[...] = _conv_same(pc1_ref, wc1_ref, 3, L) + bc1_ref[...]
    h = _gelu(jnp.maximum(t1_ref[pl.ds(0, L2, stride=2), :],
                          t1_ref[pl.ds(1, L2, stride=2), :]))     # (L//2, 16)

    # ---- conv2 (k=3, pad=1) -> MaxPool1d(2,2) -> GELU -----------------------
    _store_center(pc2_ref, h, 1)
    t2_ref[...] = _conv_same(pc2_ref, wc2_ref, 3, L2) + bc2_ref[...]
    h = _gelu(jnp.maximum(t2_ref[pl.ds(0, L4, stride=2), :],
                          t2_ref[pl.ds(1, L4, stride=2), :]))     # (L//4, 8)

    # ---- head: Linear(8*(dim//4), n_classes) on the channel-major flatten ---
    # wh_ref[c] is (n_classes, L//4) = head.weight[:, c*(L//4):(c+1)*(L//4)],
    # so summing per-channel dots reproduces torch's view(B, -1) @ W.T exactly
    # without any in-kernel transpose / reshape.
    out = bh_ref[...]                                             # (n, 1)
    for c in range(8):                                            # static
        out = out + jnp.dot(wh_ref[c], h[:, c:c + 1],
                            preferred_element_type=jnp.float32)
    o_ref[0] = out.astype(o_ref.dtype)


# ---------------------------------------------------------------------------
# Wrapper
# ---------------------------------------------------------------------------
def ts_encoder_forward(ts, p):
    # ts: (B, dim)   -- PyTorch does ts.unsqueeze(1).unsqueeze(1) -> (B,1,1,dim)
    B, L = ts.shape
    assert L % 4 == 0, "dim must be divisible by 4 (two MaxPool1d(2,2) stages)"
    n_classes = p["bh"].shape[0]
    x = ts.reshape(B, L, 1).astype(jnp.float32)          # channels-last (B,L,1)

    w_args = (p["w0"], p["s0"], p["w3"], p["s3"], p["w1"], p["s1"],
              p["w2"], p["s2"], p["wc1"], p["bc1"], p["wc2"], p["bc2"],
              p["wh3"], p["bh"])

    in_specs = [pl.BlockSpec((1, L, 1), lambda b: (b, 0, 0))]
    for a in w_args:                                     # weights: full blocks,
        in_specs.append(pl.BlockSpec(                    # VMEM-resident
            a.shape, (lambda nd: (lambda b: (0,) * nd))(a.ndim)))

    out = pl.pallas_call(
        _fused_tsencoder_kernel,
        out_shape=jax.ShapeDtypeStruct((B, n_classes, 1), jnp.float32),
        grid=(B,),
        in_specs=in_specs,
        out_specs=pl.BlockSpec((1, n_classes, 1), lambda b: (b, 0, 0)),
        scratch_shapes=[
            pltpu.VMEM((L + 7, 1), jnp.float32),        # padded raw input
            pltpu.VMEM((L + 7, 32), jnp.float32),       # padded embed_layer out
            pltpu.VMEM((L + 7, 64), jnp.float32),       # padded embed_layer3 out
            pltpu.VMEM((L + 2, 32), jnp.float32),       # padded conv1 input
            pltpu.VMEM((L, 16), jnp.float32),           # conv1 pre-pool
            pltpu.VMEM((L // 2 + 2, 16), jnp.float32),  # padded conv2 input
            pltpu.VMEM((L // 2, 8), jnp.float32),       # conv2 pre-pool
        ],
        compiler_params=pltpu.CompilerParams(
            dimension_semantics=("parallel",)),          # megacore on v7x
    )(x, *w_args)
    return out.reshape(B, n_classes)


# ---------------------------------------------------------------------------
# Parameter initialization (deterministic, synthetic, torch layouts folded
# host-side into the kernel layouts)
# ---------------------------------------------------------------------------
def init_params(key, dim, n_classes):
    eps = 1e-5

    def conv_bn_fold(k, cin, cout, K):
        # Conv2d(cin, cout, [1,K]) + BatchNorm2d(cout) in eval mode
        # (running_mean=0, running_var=1); BN scale folded into the weights,
        # conv bias folded into the shift.
        k1, k2, k3, k4 = jax.random.split(k, 4)
        w = 0.1 * jax.random.normal(k1, (cout, cin, K), jnp.float32)  # torch
        b = 0.1 * jax.random.normal(k2, (cout,), jnp.float32)
        gamma = 1.0 + 0.1 * jax.random.normal(k3, (cout,), jnp.float32)
        beta = 0.1 * jax.random.normal(k4, (cout,), jnp.float32)
        scale = gamma / jnp.sqrt(1.0 + eps)
        shift = beta + scale * b
        w_kio = jnp.transpose(w, (2, 1, 0)) * scale[None, None, :]    # (K,Ci,Co)
        return w_kio, shift[None, :]

    def conv1d_params(k, cin, cout, K):
        k1, k2 = jax.random.split(k)
        w = 0.1 * jax.random.normal(k1, (cout, cin, K), jnp.float32)  # torch
        b = 0.1 * jax.random.normal(k2, (cout,), jnp.float32)
        return jnp.transpose(w, (2, 1, 0)), b[None, :]                # (K,Ci,Co)

    ks = jax.random.split(key, 8)
    p = {}
    p["w0"], p["s0"] = conv_bn_fold(ks[0], 1, 32, 8)     # embed_layer : 1 -> 32
    p["w3"], p["s3"] = conv_bn_fold(ks[1], 32, 64, 8)    # embed_layer3: 32 -> 64
    p["w1"], p["s1"] = conv_bn_fold(ks[2], 64, 32, 8)    # embed_layer1: 64 -> 32
    w2_kio, s2 = conv_bn_fold(ks[3], 32, 32, 1)          # embed_layer2: 1x1 conv
    p["w2"], p["s2"] = w2_kio[0], s2                     # (32, 32), (1, 32)
    p["wc1"], p["bc1"] = conv1d_params(ks[4], 32, 16, 3)
    p["wc2"], p["bc2"] = conv1d_params(ks[5], 16, 8, 3)

    L4 = dim // 4
    feat = 8 * L4
    head_w = 0.1 * jax.random.normal(ks[6], (n_classes, feat), jnp.float32)
    head_b = 0.1 * jax.random.normal(ks[7], (n_classes,), jnp.float32)
    # rearrange for the in-kernel channel-major contraction:
    #   wh3[c, j, l] = head_w[j, c*L4 + l]
    p["wh3"] = jnp.transpose(head_w.reshape(n_classes, 8, L4), (1, 0, 2))
    p["bh"] = head_b[:, None]                            # (n_classes, 1)
    return p


if __name__ == "__main__":
    key = jax.random.PRNGKey(0)
    B, dim, n_classes = 2, 16, 5
    k_in, k_par = jax.random.split(key)
    ts = jax.random.normal(k_in, (B, dim), jnp.float32)
    params = init_params(k_par, dim, n_classes)

    out = jax.block_until_ready(ts_encoder_forward(ts, params))
    assert out.shape == (B, n_classes), out.shape
    assert bool(jnp.all(jnp.isfinite(out)))
    print("KERNEL_OK")
</pallas_src>

<mosaic_0001>
module attributes {stable_mosaic.version = 11 : i64} {
  func.func @_fused_tsencoder_kernel(%arg0: i32, %arg1: memref<1x16x1xf32, #tpu.memory_space<vmem>>, %arg2: memref<8x1x32xf32, #tpu.memory_space<vmem>>, %arg3: memref<1x32xf32, #tpu.memory_space<vmem>>, %arg4: memref<8x32x64xf32, #tpu.memory_space<vmem>>, %arg5: memref<1x64xf32, #tpu.memory_space<vmem>>, %arg6: memref<8x64x32xf32, #tpu.memory_space<vmem>>, %arg7: memref<1x32xf32, #tpu.memory_space<vmem>>, %arg8: memref<32x32xf32, #tpu.memory_space<vmem>>, %arg9: memref<1x32xf32, #tpu.memory_space<vmem>>, %arg10: memref<3x32x16xf32, #tpu.memory_space<vmem>>, %arg11: memref<1x16xf32, #tpu.memory_space<vmem>>, %arg12: memref<3x16x8xf32, #tpu.memory_space<vmem>>, %arg13: memref<1x8xf32, #tpu.memory_space<vmem>>, %arg14: memref<8x5x4xf32, #tpu.memory_space<vmem>>, %arg15: memref<5x1xf32, #tpu.memory_space<vmem>>, %arg16: memref<1x5x1xf32, #tpu.memory_space<vmem>>, %arg17: memref<23x1xf32, #tpu.memory_space<vmem>>, %arg18: memref<23x32xf32, #tpu.memory_space<vmem>>, %arg19: memref<23x64xf32, #tpu.memory_space<vmem>>, %arg20: memref<18x32xf32, #tpu.memory_space<vmem>>, %arg21: memref<16x16xf32, #tpu.memory_space<vmem>>, %arg22: memref<10x16xf32, #tpu.memory_space<vmem>>, %arg23: memref<8x8xf32, #tpu.memory_space<vmem>>) attributes {dimension_semantics = [#tpu.dimension_semantics<parallel>], iteration_bounds = array<i64: 2>, scalar_prefetch = 0 : i64, scratch_operands = 7 : i64, tpu.core_type = #tpu.core_type<tc>, window_params = [{transform_indices = @transform_0, window_bounds = array<i64: 1, 16, 1>}, {pipeline_mode = #tpu.pipeline_mode<synchronous>, transform_indices = @transform_1, window_bounds = array<i64: 8, 1, 32>}, {pipeline_mode = #tpu.pipeline_mode<synchronous>, transform_indices = @transform_2, window_bounds = array<i64: 1, 32>}, {pipeline_mode = #tpu.pipeline_mode<synchronous>, transform_indices = @transform_3, window_bounds = array<i64: 8, 32, 64>}, {pipeline_mode = #tpu.pipeline_mode<synchronous>, transform_indices = @transform_4, window_bounds = array<i64: 1, 64>}, {pipeline_mode = #tpu.pipeline_mode<synchronous>, transform_indices = @transform_5, window_bounds = array<i64: 8, 64, 32>}, {pipeline_mode = #tpu.pipeline_mode<synchronous>, transform_indices = @transform_6, window_bounds = array<i64: 1, 32>}, {pipeline_mode = #tpu.pipeline_mode<synchronous>, transform_indices = @transform_7, window_bounds = array<i64: 32, 32>}, {pipeline_mode = #tpu.pipeline_mode<synchronous>, transform_indices = @transform_8, window_bounds = array<i64: 1, 32>}, {pipeline_mode = #tpu.pipeline_mode<synchronous>, transform_indices = @transform_9, window_bounds = array<i64: 3, 32, 16>}, {pipeline_mode = #tpu.pipeline_mode<synchronous>, transform_indices = @transform_10, window_bounds = array<i64: 1, 16>}, {pipeline_mode = #tpu.pipeline_mode<synchronous>, transform_indices = @transform_11, window_bounds = array<i64: 3, 16, 8>}, {pipeline_mode = #tpu.pipeline_mode<synchronous>, transform_indices = @transform_12, window_bounds = array<i64: 1, 8>}, {pipeline_mode = #tpu.pipeline_mode<synchronous>, transform_indices = @transform_13, window_bounds = array<i64: 8, 5, 4>}, {pipeline_mode = #tpu.pipeline_mode<synchronous>, transform_indices = @transform_14, window_bounds = array<i64: 5, 1>}, {transform_indices = @transform_15, window_bounds = array<i64: 1, 5, 1>}]} {
    %c0_i32 = arith.constant 0 : i32
    %0 = arith.cmpi eq, %arg0, %c0_i32 : i32
    %1 = arith.extui %0 : i1 to i32
    %c0_i32_0 = arith.constant 0 : i32
    %2 = arith.cmpi ne, %1, %c0_i32_0 : i32
    scf.if %2 {
      %cst_209 = arith.constant 0.000000e+00 : f32
      %296 = vector.broadcast %cst_209 : f32 to vector<23x1xf32>
      %c0_210 = arith.constant 0 : index
      %c0_211 = arith.constant 0 : index
      %297 = vector.load %arg17[%c0_210, %c0_211] : memref<23x1xf32, #tpu.memory_space<vmem>>, vector<23x1xf32>
      tpu.vector_store %arg17[%c0_210, %c0_211], %296 {strides = array<i32>} : memref<23x1xf32, #tpu.memory_space<vmem>>, vector<23x1xf32>,
      %cst_212 = arith.constant 0.000000e+00 : f32
      %298 = vector.broadcast %cst_212 : f32 to vector<23x32xf32>
      %c0_213 = arith.constant 0 : index
      %c0_214 = arith.constant 0 : index
      %299 = vector.load %arg18[%c0_213, %c0_214] : memref<23x32xf32, #tpu.memory_space<vmem>>, vector<23x32xf32>
      tpu.vector_store %arg18[%c0_213, %c0_214], %298 {strides = array<i32>} : memref<23x32xf32, #tpu.memory_space<vmem>>, vector<23x32xf32>,
      %cst_215 = arith.constant 0.000000e+00 : f32
      %300 = vector.broadcast %cst_215 : f32 to vector<23x64xf32>
      %c0_216 = arith.constant 0 : index
      %c0_217 = arith.constant 0 : index
      %301 = vector.load %arg19[%c0_216, %c0_217] : memref<23x64xf32, #tpu.memory_space<vmem>>, vector<23x64xf32>
      tpu.vector_store %arg19[%c0_216, %c0_217], %300 {strides = array<i32>} : memref<23x64xf32, #tpu.memory_space<vmem>>, vector<23x64xf32>,
      %cst_218 = arith.constant 0.000000e+00 : f32
      %302 = vector.broadcast %cst_218 : f32 to vector<18x32xf32>
      %c0_219 = arith.constant 0 : index
      %c0_220 = arith.constant 0 : index
      %303 = vector.load %arg20[%c0_219, %c0_220] : memref<18x32xf32, #tpu.memory_space<vmem>>, vector<18x32xf32>
      tpu.vector_store %arg20[%c0_219, %c0_220], %302 {strides = array<i32>} : memref<18x32xf32, #tpu.memory_space<vmem>>, vector<18x32xf32>,
      %cst_221 = arith.constant 0.000000e+00 : f32
      %304 = vector.broadcast %cst_221 : f32 to vector<10x16xf32>
      %c0_222 = arith.constant 0 : index
      %c0_223 = arith.constant 0 : index
      %305 = vector.load %arg22[%c0_222, %c0_223] : memref<10x16xf32, #tpu.memory_space<vmem>>, vector<10x16xf32>
      tpu.vector_store %arg22[%c0_222, %c0_223], %304 {strides = array<i32>} : memref<10x16xf32, #tpu.memory_space<vmem>>, vector<10x16xf32>,
    } else {
    }
    %c0 = arith.constant 0 : index
    %c0_1 = arith.constant 0 : index
    %c0_2 = arith.constant 0 : index
    %3 = vector.load %arg1[%c0, %c0_1, %c0_2] : memref<1x16x1xf32, #tpu.memory_space<vmem>>, vector<1x16x1xf32>
    %4 = vector.shape_cast %3 : vector<1x16x1xf32> to vector<16x1xf32>
    %c3 = arith.constant 3 : index
    %c0_3 = arith.constant 0 : index
    %5 = vector.load %arg17[%c3, %c0_3] : memref<23x1xf32, #tpu.memory_space<vmem>>, vector<16x1xf32>
    tpu.vector_store %arg17[%c3, %c0_3], %4 {strides = array<i32>} : memref<23x1xf32, #tpu.memory_space<vmem>>, vector<16x1xf32>,
    %c0_4 = arith.constant 0 : index
    %c0_5 = arith.constant 0 : index
    %6 = vector.load %arg17[%c0_4, %c0_5] : memref<23x1xf32, #tpu.memory_space<vmem>>, vector<23x1xf32>
    %7 = vector.extract_strided_slice %6 {offsets = [0, 0], sizes = [16, 1], strides = [1, 1]} : vector<23x1xf32> to vector<16x1xf32>
    %c0_6 = arith.constant 0 : index
    %c0_7 = arith.constant 0 : index
    %c0_8 = arith.constant 0 : index
    %8 = vector.load %arg2[%c0_6, %c0_7, %c0_8] : memref<8x1x32xf32, #tpu.memory_space<vmem>>, vector<1x1x32xf32>
    %9 = vector.shape_cast %8 : vector<1x1x32xf32> to vector<1x32xf32>
    %10 = vector.broadcast %7 : vector<16x1xf32> to vector<16x32xf32>
    %11 = vector.broadcast %9 : vector<1x32xf32> to vector<16x32xf32>
    %12 = arith.mulf %10, %11 : vector<16x32xf32>
    %13 = vector.extract_strided_slice %6 {offsets = [1, 0], sizes = [16, 1], strides = [1, 1]} : vector<23x1xf32> to vector<16x1xf32>
    %c1 = arith.constant 1 : index
    %c0_9 = arith.constant 0 : index
    %c0_10 = arith.constant 0 : index
    %14 = vector.load %arg2[%c1, %c0_9, %c0_10] : memref<8x1x32xf32, #tpu.memory_space<vmem>>, vector<1x1x32xf32>
    %15 = vector.shape_cast %14 : vector<1x1x32xf32> to vector<1x32xf32>
    %16 = vector.broadcast %13 : vector<16x1xf32> to vector<16x32xf32>
    %17 = vector.broadcast %15 : vector<1x32xf32> to vector<16x32xf32>
    %18 = arith.mulf %16, %17 : vector<16x32xf32>
    %19 = arith.addf %12, %18 : vector<16x32xf32>
    %20 = vector.extract_strided_slice %6 {offsets = [2, 0], sizes = [16, 1], strides = [1, 1]} : vector<23x1xf32> to vector<16x1xf32>
    %c2 = arith.constant 2 : index
    %c0_11 = arith.constant 0 : index
    %c0_12 = arith.constant 0 : index
    %21 = vector.load %arg2[%c2, %c0_11, %c0_12] : memref<8x1x32xf32, #tpu.memory_space<vmem>>, vector<1x1x32xf32>
    %22 = vector.shape_cast %21 : vector<1x1x32xf32> to vector<1x32xf32>
    %23 = vector.broadcast %20 : vector<16x1xf32> to vector<16x32xf32>
    %24 = vector.broadcast %22 : vector<1x32xf32> to vector<16x32xf32>
    %25 = arith.mulf %23, %24 : vector<16x32xf32>
    %26 = arith.addf %19, %25 : vector<16x32xf32>
    %27 = vector.extract_strided_slice %6 {offsets = [3, 0], sizes = [16, 1], strides = [1, 1]} : vector<23x1xf32> to vector<16x1xf32>
    %c3_13 = arith.constant 3 : index
    %c0_14 = arith.constant 0 : index
    %c0_15 = arith.constant 0 : index
    %28 = vector.load %arg2[%c3_13, %c0_14, %c0_15] : memref<8x1x32xf32, #tpu.memory_space<vmem>>, vector<1x1x32xf32>
    %29 = vector.shape_cast %28 : vector<1x1x32xf32> to vector<1x32xf32>
    %30 = vector.broadcast %27 : vector<16x1xf32> to vector<16x32xf32>
    %31 = vector.broadcast %29 : vector<1x32xf32> to vector<16x32xf32>
    %32 = arith.mulf %30, %31 : vector<16x32xf32>
    %33 = arith.addf %26, %32 : vector<16x32xf32>
    %34 = vector.extract_strided_slice %6 {offsets = [4, 0], sizes = [16, 1], strides = [1, 1]} : vector<23x1xf32> to vector<16x1xf32>
    %c4 = arith.constant 4 : index
    %c0_16 = arith.constant 0 : index
    %c0_17 = arith.constant 0 : index
    %35 = vector.load %arg2[%c4, %c0_16, %c0_17] : memref<8x1x32xf32, #tpu.memory_space<vmem>>, vector<1x1x32xf32>
    %36 = vector.shape_cast %35 : vector<1x1x32xf32> to vector<1x32xf32>
    %37 = vector.broadcast %34 : vector<16x1xf32> to vector<16x32xf32>
    %38 = vector.broadcast %36 : vector<1x32xf32> to vector<16x32xf32>
    %39 = arith.mulf %37, %38 : vector<16x32xf32>
    %40 = arith.addf %33, %39 : vector<16x32xf32>
    %41 = vector.extract_strided_slice %6 {offsets = [5, 0], sizes = [16, 1], strides = [1, 1]} : vector<23x1xf32> to vector<16x1xf32>
    %c5 = arith.constant 5 : index
    %c0_18 = arith.constant 0 : index
    %c0_19 = arith.constant 0 : index
    %42 = vector.load %arg2[%c5, %c0_18, %c0_19] : memref<8x1x32xf32, #tpu.memory_space<vmem>>, vector<1x1x32xf32>
    %43 = vector.shape_cast %42 : vector<1x1x32xf32> to vector<1x32xf32>
    %44 = vector.broadcast %41 : vector<16x1xf32> to vector<16x32xf32>
    %45 = vector.broadcast %43 : vector<1x32xf32> to vector<16x32xf32>
    %46 = arith.mulf %44, %45 : vector<16x32xf32>
    %47 = arith.addf %40, %46 : vector<16x32xf32>
    %48 = vector.extract_strided_slice %6 {offsets = [6, 0], sizes = [16, 1], strides = [1, 1]} : vector<23x1xf32> to vector<16x1xf32>
    %c6 = arith.constant 6 : index
    %c0_20 = arith.constant 0 : index
    %c0_21 = arith.constant 0 : index
    %49 = vector.load %arg2[%c6, %c0_20, %c0_21] : memref<8x1x32xf32, #tpu.memory_space<vmem>>, vector<1x1x32xf32>
    %50 = vector.shape_cast %49 : vector<1x1x32xf32> to vector<1x32xf32>
    %51 = vector.broadcast %48 : vector<16x1xf32> to vector<16x32xf32>
    %52 = vector.broadcast %50 : vector<1x32xf32> to vector<16x32xf32>
    %53 = arith.mulf %51, %52 : vector<16x32xf32>
    %54 = arith.addf %47, %53 : vector<16x32xf32>
    %55 = vector.extract_strided_slice %6 {offsets = [7, 0], sizes = [16, 1], strides = [1, 1]} : vector<23x1xf32> to vector<16x1xf32>
    %c7 = arith.constant 7 : index
    %c0_22 = arith.constant 0 : index
    %c0_23 = arith.constant 0 : index
    %56 = vector.load %arg2[%c7, %c0_22, %c0_23] : memref<8x1x32xf32, #tpu.memory_space<vmem>>, vector<1x1x32xf32>
    %57 = vector.shape_cast %56 : vector<1x1x32xf32> to vector<1x32xf32>
    %58 = vector.broadcast %55 : vector<16x1xf32> to vector<16x32xf32>
    %59 = vector.broadcast %57 : vector<1x32xf32> to vector<16x32xf32>
    %60 = arith.mulf %58, %59 : vector<16x32xf32>
    %61 = arith.addf %54, %60 : vector<16x32xf32>
    %c0_24 = arith.constant 0 : index
    %c0_25 = arith.constant 0 : index
    %62 = vector.load %arg3[%c0_24, %c0_25] : memref<1x32xf32, #tpu.memory_space<vmem>>, vector<1x32xf32>
    %63 = vector.broadcast %62 : vector<1x32xf32> to vector<16x32xf32>
    %64 = arith.addf %61, %63 : vector<16x32xf32>
    %cst = arith.constant 5.000000e-01 : f32
    %65 = vector.broadcast %cst : f32 to vector<16x32xf32>
    %66 = arith.mulf %65, %64 : vector<16x32xf32>
    %cst_26 = arith.constant 0.707106769 : f32
    %67 = vector.broadcast %cst_26 : f32 to vector<16x32xf32>
    %68 = arith.mulf %64, %67 : vector<16x32xf32>
    %69 = math.erf %68 : vector<16x32xf32>
    %cst_27 = arith.constant 1.000000e+00 : f32
    %70 = vector.broadcast %cst_27 : f32 to vector<16x32xf32>
    %71 = arith.addf %70, %69 : vector<16x32xf32>
    %72 = arith.mulf %66, %71 : vector<16x32xf32>
    %c3_28 = arith.constant 3 : index
    %c0_29 = arith.constant 0 : index
    %73 = vector.load %arg18[%c3_28, %c0_29] : memref<23x32xf32, #tpu.memory_space<vmem>>, vector<16x32xf32>
    tpu.vector_store %arg18[%c3_28, %c0_29], %72 {strides = array<i32>} : memref<23x32xf32, #tpu.memory_space<vmem>>, vector<16x32xf32>,
    %c0_30 = arith.constant 0 : index
    %c0_31 = arith.constant 0 : index
    %74 = vector.load %arg18[%c0_30, %c0_31] : memref<23x32xf32, #tpu.memory_space<vmem>>, vector<23x32xf32>
    %75 = vector.extract_strided_slice %74 {offsets = [0, 0], sizes = [16, 32], strides = [1, 1]} : vector<23x32xf32> to vector<16x32xf32>
    %c0_32 = arith.constant 0 : index
    %c0_33 = arith.constant 0 : index
    %c0_34 = arith.constant 0 : index
    %76 = vector.load %arg4[%c0_32, %c0_33, %c0_34] : memref<8x32x64xf32, #tpu.memory_space<vmem>>, vector<1x32x64xf32>
    %77 = vector.shape_cast %76 : vector<1x32x64xf32> to vector<32x64xf32>
    %cst_35 = arith.constant dense<0.000000e+00> : vector<16x64xf32>
    %78 = tpu.matmul %75, %77, %cst_35 {dimension_numbers = #tpu.dot_dimension_numbers<[1], [0], [0], [1], [0, 0, 1, 1], [], []>} : vector<16x32xf32>, vector<32x64xf32>, vector<16x64xf32> -> vector<16x64xf32>
    %79 = vector.extract_strided_slice %74 {offsets = [1, 0], sizes = [16, 32], strides = [1, 1]} : vector<23x32xf32> to vector<16x32xf32>
    %c1_36 = arith.constant 1 : index
    %c0_37 = arith.constant 0 : index
    %c0_38 = arith.constant 0 : index
    %80 = vector.load %arg4[%c1_36, %c0_37, %c0_38] : memref<8x32x64xf32, #tpu.memory_space<vmem>>, vector<1x32x64xf32>
    %81 = vector.shape_cast %80 : vector<1x32x64xf32> to vector<32x64xf32>
    %cst_39 = arith.constant dense<0.000000e+00> : vector<16x64xf32>
    %82 = tpu.matmul %79, %81, %cst_39 {dimension_numbers = #tpu.dot_dimension_numbers<[1], [0], [0], [1], [0, 0, 1, 1], [], []>} : vector<16x32xf32>, vector<32x64xf32>, vector<16x64xf32> -> vector<16x64xf32>
    %83 = arith.addf %78, %82 : vector<16x64xf32>
    %84 = vector.extract_strided_slice %74 {offsets = [2, 0], sizes = [16, 32], strides = [1, 1]} : vector<23x32xf32> to vector<16x32xf32>
    %c2_40 = arith.constant 2 : index
    %c0_41 = arith.constant 0 : index
    %c0_42 = arith.constant 0 : index
    %85 = vector.load %arg4[%c2_40, %c0_41, %c0_42] : memref<8x32x64xf32, #tpu.memory_space<vmem>>, vector<1x32x64xf32>
    %86 = vector.shape_cast %85 : vector<1x32x64xf32> to vector<32x64xf32>
    %cst_43 = arith.constant dense<0.000000e+00> : vector<16x64xf32>
    %87 = tpu.matmul %84, %86, %cst_43 {dimension_numbers = #tpu.dot_dimension_numbers<[1], [0], [0], [1], [0, 0, 1, 1], [], []>} : vector<16x32xf32>, vector<32x64xf32>, vector<16x64xf32> -> vector<16x64xf32>
    %88 = arith.addf %83, %87 : vector<16x64xf32>
    %89 = vector.extract_strided_slice %74 {offsets = [3, 0], sizes = [16, 32], strides = [1, 1]} : vector<23x32xf32> to vector<16x32xf32>
    %c3_44 = arith.constant 3 : index
    %c0_45 = arith.constant 0 : index
    %c0_46 = arith.constant 0 : index
    %90 = vector.load %arg4[%c3_44, %c0_45, %c0_46] : memref<8x32x64xf32, #tpu.memory_space<vmem>>, vector<1x32x64xf32>
    %91 = vector.shape_cast %90 : vector<1x32x64xf32> to vector<32x64xf32>
    %cst_47 = arith.constant dense<0.000000e+00> : vector<16x64xf32>
    %92 = tpu.matmul %89, %91, %cst_47 {dimension_numbers = #tpu.dot_dimension_numbers<[1], [0], [0], [1], [0, 0, 1, 1], [], []>} : vector<16x32xf32>, vector<32x64xf32>, vector<16x64xf32> -> vector<16x64xf32>
    %93 = arith.addf %88, %92 : vector<16x64xf32>
    %94 = vector.extract_strided_slice %74 {offsets = [4, 0], sizes = [16, 32], strides = [1, 1]} : vector<23x32xf32> to vector<16x32xf32>
    %c4_48 = arith.constant 4 : index
    %c0_49 = arith.constant 0 : index
    %c0_50 = arith.constant 0 : index
    %95 = vector.load %arg4[%c4_48, %c0_49, %c0_50] : memref<8x32x64xf32, #tpu.memory_space<vmem>>, vector<1x32x64xf32>
    %96 = vector.shape_cast %95 : vector<1x32x64xf32> to vector<32x64xf32>
    %cst_51 = arith.constant dense<0.000000e+00> : vector<16x64xf32>
    %97 = tpu.matmul %94, %96, %cst_51 {dimension_numbers = #tpu.dot_dimension_numbers<[1], [0], [0], [1], [0, 0, 1, 1], [], []>} : vector<16x32xf32>, vector<32x64xf32>, vector<16x64xf32> -> vector<16x64xf32>
    %98 = arith.addf %93, %97 : vector<16x64xf32>
    %99 = vector.extract_strided_slice %74 {offsets = [5, 0], sizes = [16, 32], strides = [1, 1]} : vector<23x32xf32> to vector<16x32xf32>
    %c5_52 = arith.constant 5 : index
    %c0_53 = arith.constant 0 : index
    %c0_54 = arith.constant 0 : index
    %100 = vector.load %arg4[%c5_52, %c0_53, %c0_54] : memref<8x32x64xf32, #tpu.memory_space<vmem>>, vector<1x32x64xf32>
    %101 = vector.shape_cast %100 : vector<1x32x64xf32> to vector<32x64xf32>
    %cst_55 = arith.constant dense<0.000000e+00> : vector<16x64xf32>
    %102 = tpu.matmul %99, %101, %cst_55 {dimension_numbers = #tpu.dot_dimension_numbers<[1], [0], [0], [1], [0, 0, 1, 1], [], []>} : vector<16x32xf32>, vector<32x64xf32>, vector<16x64xf32> -> vector<16x64xf32>
    %103 = arith.addf %98, %102 : vector<16x64xf32>
    %104 = vector.extract_strided_slice %74 {offsets = [6, 0], sizes = [16, 32], strides = [1, 1]} : vector<23x32xf32> to vector<16x32xf32>
    %c6_56 = arith.constant 6 : index
    %c0_57 = arith.constant 0 : index
    %c0_58 = arith.constant 0 : index
    %105 = vector.load %arg4[%c6_56, %c0_57, %c0_58] : memref<8x32x64xf32, #tpu.memory_space<vmem>>, vector<1x32x64xf32>
    %106 = vector.shape_cast %105 : vector<1x32x64xf32> to vector<32x64xf32>
    %cst_59 = arith.constant dense<0.000000e+00> : vector<16x64xf32>
    %107 = tpu.matmul %104, %106, %cst_59 {dimension_numbers = #tpu.dot_dimension_numbers<[1], [0], [0], [1], [0, 0, 1, 1], [], []>} : vector<16x32xf32>, vector<32x64xf32>, vector<16x64xf32> -> vector<16x64xf32>
    %108 = arith.addf %103, %107 : vector<16x64xf32>
    %109 = vector.extract_strided_slice %74 {offsets = [7, 0], sizes = [16, 32], strides = [1, 1]} : vector<23x32xf32> to vector<16x32xf32>
    %c7_60 = arith.constant 7 : index
    %c0_61 = arith.constant 0 : index
    %c0_62 = arith.constant 0 : index
    %110 = vector.load %arg4[%c7_60, %c0_61, %c0_62] : memref<8x32x64xf32, #tpu.memory_space<vmem>>, vector<1x32x64xf32>
    %111 = vector.shape_cast %110 : vector<1x32x64xf32> to vector<32x64xf32>
    %cst_63 = arith.constant dense<0.000000e+00> : vector<16x64xf32>
    %112 = tpu.matmul %109, %111, %cst_63 {dimension_numbers = #tpu.dot_dimension_numbers<[1], [0], [0], [1], [0, 0, 1, 1], [], []>} : vector<16x32xf32>, vector<32x64xf32>, vector<16x64xf32> -> vector<16x64xf32>
    %113 = arith.addf %108, %112 : vector<16x64xf32>
    %c0_64 = arith.constant 0 : index
    %c0_65 = arith.constant 0 : index
    %114 = vector.load %arg5[%c0_64, %c0_65] : memref<1x64xf32, #tpu.memory_space<vmem>>, vector<1x64xf32>
    %115 = vector.broadcast %114 : vector<1x64xf32> to vector<16x64xf32>
    %116 = arith.addf %113, %115 : vector<16x64xf32>
    %cst_66 = arith.constant 5.000000e-01 : f32
    %117 = vector.broadcast %cst_66 : f32 to vector<16x64xf32>
    %118 = arith.mulf %117, %116 : vector<16x64xf32>
    %cst_67 = arith.constant 0.707106769 : f32
    %119 = vector.broadcast %cst_67 : f32 to vector<16x64xf32>
    %120 = arith.mulf %116, %119 : vector<16x64xf32>
    %121 = math.erf %120 : vector<16x64xf32>
    %cst_68 = arith.constant 1.000000e+00 : f32
    %122 = vector.broadcast %cst_68 : f32 to vector<16x64xf32>
    %123 = arith.addf %122, %121 : vector<16x64xf32>
    %124 = arith.mulf %118, %123 : vector<16x64xf32>
    %c3_69 = arith.constant 3 : index
    %c0_70 = arith.constant 0 : index
    %125 = vector.load %arg19[%c3_69, %c0_70] : memref<23x64xf32, #tpu.memory_space<vmem>>, vector<16x64xf32>
    tpu.vector_store %arg19[%c3_69, %c0_70], %124 {strides = array<i32>} : memref<23x64xf32, #tpu.memory_space<vmem>>, vector<16x64xf32>,
    %c0_71 = arith.constant 0 : index
    %c0_72 = arith.constant 0 : index
    %126 = vector.load %arg19[%c0_71, %c0_72] : memref<23x64xf32, #tpu.memory_space<vmem>>, vector<23x64xf32>
    %127 = vector.extract_strided_slice %126 {offsets = [0, 0], sizes = [16, 64], strides = [1, 1]} : vector<23x64xf32> to vector<16x64xf32>
    %c0_73 = arith.constant 0 : index
    %c0_74 = arith.constant 0 : index
    %c0_75 = arith.constant 0 : index
    %128 = vector.load %arg6[%c0_73, %c0_74, %c0_75] : memref<8x64x32xf32, #tpu.memory_space<vmem>>, vector<1x64x32xf32>
    %129 = vector.shape_cast %128 : vector<1x64x32xf32> to vector<64x32xf32>
    %cst_76 = arith.constant dense<0.000000e+00> : vector<16x32xf32>
    %130 = tpu.matmul %127, %129, %cst_76 {dimension_numbers = #tpu.dot_dimension_numbers<[1], [0], [0], [1], [0, 0, 1, 1], [], []>} : vector<16x64xf32>, vector<64x32xf32>, vector<16x32xf32> -> vector<16x32xf32>
    %131 = vector.extract_strided_slice %126 {offsets = [1, 0], sizes = [16, 64], strides = [1, 1]} : vector<23x64xf32> to vector<16x64xf32>
    %c1_77 = arith.constant 1 : index
    %c0_78 = arith.constant 0 : index
    %c0_79 = arith.constant 0 : index
    %132 = vector.load %arg6[%c1_77, %c0_78, %c0_79] : memref<8x64x32xf32, #tpu.memory_space<vmem>>, vector<1x64x32xf32>
    %133 = vector.shape_cast %132 : vector<1x64x32xf32> to vector<64x32xf32>
    %cst_80 = arith.constant dense<0.000000e+00> : vector<16x32xf32>
    %134 = tpu.matmul %131, %133, %cst_80 {dimension_numbers = #tpu.dot_dimension_numbers<[1], [0], [0], [1], [0, 0, 1, 1], [], []>} : vector<16x64xf32>, vector<64x32xf32>, vector<16x32xf32> -> vector<16x32xf32>
    %135 = arith.addf %130, %134 : vector<16x32xf32>
    %136 = vector.extract_strided_slice %126 {offsets = [2, 0], sizes = [16, 64], strides = [1, 1]} : vector<23x64xf32> to vector<16x64xf32>
    %c2_81 = arith.constant 2 : index
    %c0_82 = arith.constant 0 : index
    %c0_83 = arith.constant 0 : index
    %137 = vector.load %arg6[%c2_81, %c0_82, %c0_83] : memref<8x64x32xf32, #tpu.memory_space<vmem>>, vector<1x64x32xf32>
    %138 = vector.shape_cast %137 : vector<1x64x32xf32> to vector<64x32xf32>
    %cst_84 = arith.constant dense<0.000000e+00> : vector<16x32xf32>
    %139 = tpu.matmul %136, %138, %cst_84 {dimension_numbers = #tpu.dot_dimension_numbers<[1], [0], [0], [1], [0, 0, 1, 1], [], []>} : vector<16x64xf32>, vector<64x32xf32>, vector<16x32xf32> -> vector<16x32xf32>
    %140 = arith.addf %135, %139 : vector<16x32xf32>
    %141 = vector.extract_strided_slice %126 {offsets = [3, 0], sizes = [16, 64], strides = [1, 1]} : vector<23x64xf32> to vector<16x64xf32>
    %c3_85 = arith.constant 3 : index
    %c0_86 = arith.constant 0 : index
    %c0_87 = arith.constant 0 : index
    %142 = vector.load %arg6[%c3_85, %c0_86, %c0_87] : memref<8x64x32xf32, #tpu.memory_space<vmem>>, vector<1x64x32xf32>
    %143 = vector.shape_cast %142 : vector<1x64x32xf32> to vector<64x32xf32>
    %cst_88 = arith.constant dense<0.000000e+00> : vector<16x32xf32>
    %144 = tpu.matmul %141, %143, %cst_88 {dimension_numbers = #tpu.dot_dimension_numbers<[1], [0], [0], [1], [0, 0, 1, 1], [], []>} : vector<16x64xf32>, vector<64x32xf32>, vector<16x32xf32> -> vector<16x32xf32>
    %145 = arith.addf %140, %144 : vector<16x32xf32>
    %146 = vector.extract_strided_slice %126 {offsets = [4, 0], sizes = [16, 64], strides = [1, 1]} : vector<23x64xf32> to vector<16x64xf32>
    %c4_89 = arith.constant 4 : index
    %c0_90 = arith.constant 0 : index
    %c0_91 = arith.constant 0 : index
    %147 = vector.load %arg6[%c4_89, %c0_90, %c0_91] : memref<8x64x32xf32, #tpu.memory_space<vmem>>, vector<1x64x32xf32>
    %148 = vector.shape_cast %147 : vector<1x64x32xf32> to vector<64x32xf32>
    %cst_92 = arith.constant dense<0.000000e+00> : vector<16x32xf32>
    %149 = tpu.matmul %146, %148, %cst_92 {dimension_numbers = #tpu.dot_dimension_numbers<[1], [0], [0], [1], [0, 0, 1, 1], [], []>} : vector<16x64xf32>, vector<64x32xf32>, vector<16x32xf32> -> vector<16x32xf32>
    %150 = arith.addf %145, %149 : vector<16x32xf32>
    %151 = vector.extract_strided_slice %126 {offsets = [5, 0], sizes = [16, 64], strides = [1, 1]} : vector<23x64xf32> to vector<16x64xf32>
    %c5_93 = arith.constant 5 : index
    %c0_94 = arith.constant 0 : index
    %c0_95 = arith.constant 0 : index
    %152 = vector.load %arg6[%c5_93, %c0_94, %c0_95] : memref<8x64x32xf32, #tpu.memory_space<vmem>>, vector<1x64x32xf32>
    %153 = vector.shape_cast %152 : vector<1x64x32xf32> to vector<64x32xf32>
    %cst_96 = arith.constant dense<0.000000e+00> : vector<16x32xf32>
    %154 = tpu.matmul %151, %153, %cst_96 {dimension_numbers = #tpu.dot_dimension_numbers<[1], [0], [0], [1], [0, 0, 1, 1], [], []>} : vector<16x64xf32>, vector<64x32xf32>, vector<16x32xf32> -> vector<16x32xf32>
    %155 = arith.addf %150, %154 : vector<16x32xf32>
    %156 = vector.extract_strided_slice %126 {offsets = [6, 0], sizes = [16, 64], strides = [1, 1]} : vector<23x64xf32> to vector<16x64xf32>
    %c6_97 = arith.constant 6 : index
    %c0_98 = arith.constant 0 : index
    %c0_99 = arith.constant 0 : index
    %157 = vector.load %arg6[%c6_97, %c0_98, %c0_99] : memref<8x64x32xf32, #tpu.memory_space<vmem>>, vector<1x64x32xf32>
    %158 = vector.shape_cast %157 : vector<1x64x32xf32> to vector<64x32xf32>
    %cst_100 = arith.constant dense<0.000000e+00> : vector<16x32xf32>
    %159 = tpu.matmul %156, %158, %cst_100 {dimension_numbers = #tpu.dot_dimension_numbers<[1], [0], [0], [1], [0, 0, 1, 1], [], []>} : vector<16x64xf32>, vector<64x32xf32>, vector<16x32xf32> -> vector<16x32xf32>
    %160 = arith.addf %155, %159 : vector<16x32xf32>
    %161 = vector.extract_strided_slice %126 {offsets = [7, 0], sizes = [16, 64], strides = [1, 1]} : vector<23x64xf32> to vector<16x64xf32>
    %c7_101 = arith.constant 7 : index
    %c0_102 = arith.constant 0 : index
    %c0_103 = arith.constant 0 : index
    %162 = vector.load %arg6[%c7_101, %c0_102, %c0_103] : memref<8x64x32xf32, #tpu.memory_space<vmem>>, vector<1x64x32xf32>
    %163 = vector.shape_cast %162 : vector<1x64x32xf32> to vector<64x32xf32>
    %cst_104 = arith.constant dense<0.000000e+00> : vector<16x32xf32>
    %164 = tpu.matmul %161, %163, %cst_104 {dimension_numbers = #tpu.dot_dimension_numbers<[1], [0], [0], [1], [0, 0, 1, 1], [], []>} : vector<16x64xf32>, vector<64x32xf32>, vector<16x32xf32> -> vector<16x32xf32>
    %165 = arith.addf %160, %164 : vector<16x32xf32>
    %c0_105 = arith.constant 0 : index
    %c0_106 = arith.constant 0 : index
    %166 = vector.load %arg7[%c0_105, %c0_106] : memref<1x32xf32, #tpu.memory_space<vmem>>, vector<1x32xf32>
    %167 = vector.broadcast %166 : vector<1x32xf32> to vector<16x32xf32>
    %168 = arith.addf %165, %167 : vector<16x32xf32>
    %cst_107 = arith.constant 5.000000e-01 : f32
    %169 = vector.broadcast %cst_107 : f32 to vector<16x32xf32>
    %170 = arith.mulf %169, %168 : vector<16x32xf32>
    %cst_108 = arith.constant 0.707106769 : f32
    %171 = vector.broadcast %cst_108 : f32 to vector<16x32xf32>
    %172 = arith.mulf %168, %171 : vector<16x32xf32>
    %173 = math.erf %172 : vector<16x32xf32>
    %cst_109 = arith.constant 1.000000e+00 : f32
    %174 = vector.broadcast %cst_109 : f32 to vector<16x32xf32>
    %175 = arith.addf %174, %173 : vector<16x32xf32>
    %176 = arith.mulf %170, %175 : vector<16x32xf32>
    %c0_110 = arith.constant 0 : index
    %c0_111 = arith.constant 0 : index
    %177 = vector.load %arg8[%c0_110, %c0_111] : memref<32x32xf32, #tpu.memory_space<vmem>>, vector<32x32xf32>
    %cst_112 = arith.constant dense<0.000000e+00> : vector<16x32xf32>
    %178 = tpu.matmul %176, %177, %cst_112 {dimension_numbers = #tpu.dot_dimension_numbers<[1], [0], [0], [1], [0, 0, 1, 1], [], []>} : vector<16x32xf32>, vector<32x32xf32>, vector<16x32xf32> -> vector<16x32xf32>
    %c0_113 = arith.constant 0 : index
    %c0_114 = arith.constant 0 : index
    %179 = vector.load %arg9[%c0_113, %c0_114] : memref<1x32xf32, #tpu.memory_space<vmem>>, vector<1x32xf32>
    %180 = vector.broadcast %179 : vector<1x32xf32> to vector<16x32xf32>
    %181 = arith.addf %178, %180 : vector<16x32xf32>
    %cst_115 = arith.constant 5.000000e-01 : f32
    %182 = vector.broadcast %cst_115 : f32 to vector<16x32xf32>
    %183 = arith.mulf %182, %181 : vector<16x32xf32>
    %cst_116 = arith.constant 0.707106769 : f32
    %184 = vector.broadcast %cst_116 : f32 to vector<16x32xf32>
    %185 = arith.mulf %181, %184 : vector<16x32xf32>
    %186 = math.erf %185 : vector<16x32xf32>
    %cst_117 = arith.constant 1.000000e+00 : f32
    %187 = vector.broadcast %cst_117 : f32 to vector<16x32xf32>
    %188 = arith.addf %187, %186 : vector<16x32xf32>
    %189 = arith.mulf %183, %188 : vector<16x32xf32>
    %c1_118 = arith.constant 1 : index
    %c0_119 = arith.constant 0 : index
    %190 = vector.load %arg20[%c1_118, %c0_119] : memref<18x32xf32, #tpu.memory_space<vmem>>, vector<16x32xf32>
    tpu.vector_store %arg20[%c1_118, %c0_119], %189 {strides = array<i32>} : memref<18x32xf32, #tpu.memory_space<vmem>>, vector<16x32xf32>,
    %c0_120 = arith.constant 0 : index
    %c0_121 = arith.constant 0 : index
    %191 = vector.load %arg20[%c0_120, %c0_121] : memref<18x32xf32, #tpu.memory_space<vmem>>, vector<18x32xf32>
    %192 = vector.extract_strided_slice %191 {offsets = [0, 0], sizes = [16, 32], strides = [1, 1]} : vector<18x32xf32> to vector<16x32xf32>
    %c0_122 = arith.constant 0 : index
    %c0_123 = arith.constant 0 : index
    %c0_124 = arith.constant 0 : index
    %193 = vector.load %arg10[%c0_122, %c0_123, %c0_124] : memref<3x32x16xf32, #tpu.memory_space<vmem>>, vector<1x32x16xf32>
    %194 = vector.shape_cast %193 : vector<1x32x16xf32> to vector<32x16xf32>
    %cst_125 = arith.constant dense<0.000000e+00> : vector<16x16xf32>
    %195 = tpu.matmul %192, %194, %cst_125 {dimension_numbers = #tpu.dot_dimension_numbers<[1], [0], [0], [1], [0, 0, 1, 1], [], []>} : vector<16x32xf32>, vector<32x16xf32>, vector<16x16xf32> -> vector<16x16xf32>
    %196 = vector.extract_strided_slice %191 {offsets = [1, 0], sizes = [16, 32], strides = [1, 1]} : vector<18x32xf32> to vector<16x32xf32>
    %c1_126 = arith.constant 1 : index
    %c0_127 = arith.constant 0 : index
    %c0_128 = arith.constant 0 : index
    %197 = vector.load %arg10[%c1_126, %c0_127, %c0_128] : memref<3x32x16xf32, #tpu.memory_space<vmem>>, vector<1x32x16xf32>
    %198 = vector.shape_cast %197 : vector<1x32x16xf32> to vector<32x16xf32>
    %cst_129 = arith.constant dense<0.000000e+00> : vector<16x16xf32>
    %199 = tpu.matmul %196, %198, %cst_129 {dimension_numbers = #tpu.dot_dimension_numbers<[1], [0], [0], [1], [0, 0, 1, 1], [], []>} : vector<16x32xf32>, vector<32x16xf32>, vector<16x16xf32> -> vector<16x16xf32>
    %200 = arith.addf %195, %199 : vector<16x16xf32>
    %201 = vector.extract_strided_slice %191 {offsets = [2, 0], sizes = [16, 32], strides = [1, 1]} : vector<18x32xf32> to vector<16x32xf32>
    %c2_130 = arith.constant 2 : index
    %c0_131 = arith.constant 0 : index
    %c0_132 = arith.constant 0 : index
    %202 = vector.load %arg10[%c2_130, %c0_131, %c0_132] : memref<3x32x16xf32, #tpu.memory_space<vmem>>, vector<1x32x16xf32>
    %203 = vector.shape_cast %202 : vector<1x32x16xf32> to vector<32x16xf32>
    %cst_133 = arith.constant dense<0.000000e+00> : vector<16x16xf32>
    %204 = tpu.matmul %201, %203, %cst_133 {dimension_numbers = #tpu.dot_dimension_numbers<[1], [0], [0], [1], [0, 0, 1, 1], [], []>} : vector<16x32xf32>, vector<32x16xf32>, vector<16x16xf32> -> vector<16x16xf32>
    %205 = arith.addf %200, %204 : vector<16x16xf32>
    %c0_134 = arith.constant 0 : index
    %c0_135 = arith.constant 0 : index
    %206 = vector.load %arg11[%c0_134, %c0_135] : memref<1x16xf32, #tpu.memory_space<vmem>>, vector<1x16xf32>
    %207 = vector.broadcast %206 : vector<1x16xf32> to vector<16x16xf32>
    %208 = arith.addf %205, %207 : vector<16x16xf32>
    %c0_136 = arith.constant 0 : index
    %c0_137 = arith.constant 0 : index
    %209 = vector.load %arg21[%c0_136, %c0_137] : memref<16x16xf32, #tpu.memory_space<vmem>>, vector<16x16xf32>
    tpu.vector_store %arg21[%c0_136, %c0_137], %208 {strides = array<i32>} : memref<16x16xf32, #tpu.memory_space<vmem>>, vector<16x16xf32>,
    %c0_138 = arith.constant 0 : index
    %c0_139 = arith.constant 0 : index
    %210 = tpu.strided_load %arg21[%c0_138, %c0_139] {strides = array<i32: 2, 1>} : memref<16x16xf32, #tpu.memory_space<vmem>>, vector<8x16xf32>
    %c1_140 = arith.constant 1 : index
    %c0_141 = arith.constant 0 : index
    %211 = tpu.strided_load %arg21[%c1_140, %c0_141] {strides = array<i32: 2, 1>} : memref<16x16xf32, #tpu.memory_space<vmem>>, vector<8x16xf32>
    %212 = arith.maximumf %210, %211 : vector<8x16xf32>
    %cst_142 = arith.constant 5.000000e-01 : f32
    %213 = vector.broadcast %cst_142 : f32 to vector<8x16xf32>
    %214 = arith.mulf %213, %212 : vector<8x16xf32>
    %cst_143 = arith.constant 0.707106769 : f32
    %215 = vector.broadcast %cst_143 : f32 to vector<8x16xf32>
    %216 = arith.mulf %212, %215 : vector<8x16xf32>
    %217 = math.erf %216 : vector<8x16xf32>
    %cst_144 = arith.constant 1.000000e+00 : f32
    %218 = vector.broadcast %cst_144 : f32 to vector<8x16xf32>
    %219 = arith.addf %218, %217 : vector<8x16xf32>
    %220 = arith.mulf %214, %219 : vector<8x16xf32>
    %c1_145 = arith.constant 1 : index
    %c0_146 = arith.constant 0 : index
    %221 = vector.load %arg22[%c1_145, %c0_146] : memref<10x16xf32, #tpu.memory_space<vmem>>, vector<8x16xf32>
    tpu.vector_store %arg22[%c1_145, %c0_146], %220 {strides = array<i32>} : memref<10x16xf32, #tpu.memory_space<vmem>>, vector<8x16xf32>,
    %c0_147 = arith.constant 0 : index
    %c0_148 = arith.constant 0 : index
    %222 = vector.load %arg22[%c0_147, %c0_148] : memref<10x16xf32, #tpu.memory_space<vmem>>, vector<10x16xf32>
    %223 = vector.extract_strided_slice %222 {offsets = [0, 0], sizes = [8, 16], strides = [1, 1]} : vector<10x16xf32> to vector<8x16xf32>
    %c0_149 = arith.constant 0 : index
    %c0_150 = arith.constant 0 : index
    %c0_151 = arith.constant 0 : index
    %224 = vector.load %arg12[%c0_149, %c0_150, %c0_151] : memref<3x16x8xf32, #tpu.memory_space<vmem>>, vector<1x16x8xf32>
    %225 = vector.shape_cast %224 : vector<1x16x8xf32> to vector<16x8xf32>
    %cst_152 = arith.constant dense<0.000000e+00> : vector<8x8xf32>
    %226 = tpu.matmul %223, %225, %cst_152 {dimension_numbers = #tpu.dot_dimension_numbers<[1], [0], [0], [1], [0, 0, 1, 1], [], []>} : vector<8x16xf32>, vector<16x8xf32>, vector<8x8xf32> -> vector<8x8xf32>
    %227 = vector.extract_strided_slice %222 {offsets = [1, 0], sizes = [8, 16], strides = [1, 1]} : vector<10x16xf32> to vector<8x16xf32>
    %c1_153 = arith.constant 1 : index
    %c0_154 = arith.constant 0 : index
    %c0_155 = arith.constant 0 : index
    %228 = vector.load %arg12[%c1_153, %c0_154, %c0_155] : memref<3x16x8xf32, #tpu.memory_space<vmem>>, vector<1x16x8xf32>
    %229 = vector.shape_cast %228 : vector<1x16x8xf32> to vector<16x8xf32>
    %cst_156 = arith.constant dense<0.000000e+00> : vector<8x8xf32>
    %230 = tpu.matmul %227, %229, %cst_156 {dimension_numbers = #tpu.dot_dimension_numbers<[1], [0], [0], [1], [0, 0, 1, 1], [], []>} : vector<8x16xf32>, vector<16x8xf32>, vector<8x8xf32> -> vector<8x8xf32>
    %231 = arith.addf %226, %230 : vector<8x8xf32>
    %232 = vector.extract_strided_slice %222 {offsets = [2, 0], sizes = [8, 16], strides = [1, 1]} : vector<10x16xf32> to vector<8x16xf32>
    %c2_157 = arith.constant 2 : index
    %c0_158 = arith.constant 0 : index
    %c0_159 = arith.constant 0 : index
    %233 = vector.load %arg12[%c2_157, %c0_158, %c0_159] : memref<3x16x8xf32, #tpu.memory_space<vmem>>, vector<1x16x8xf32>
    %234 = vector.shape_cast %233 : vector<1x16x8xf32> to vector<16x8xf32>
    %cst_160 = arith.constant dense<0.000000e+00> : vector<8x8xf32>
    %235 = tpu.matmul %232, %234, %cst_160 {dimension_numbers = #tpu.dot_dimension_numbers<[1], [0], [0], [1], [0, 0, 1, 1], [], []>} : vector<8x16xf32>, vector<16x8xf32>, vector<8x8xf32> -> vector<8x8xf32>
    %236 = arith.addf %231, %235 : vector<8x8xf32>
    %c0_161 = arith.constant 0 : index
    %c0_162 = arith.constant 0 : index
    %237 = vector.load %arg13[%c0_161, %c0_162] : memref<1x8xf32, #tpu.memory_space<vmem>>, vector<1x8xf32>
    %238 = vector.broadcast %237 : vector<1x8xf32> to vector<8x8xf32>
    %239 = arith.addf %236, %238 : vector<8x8xf32>
    %c0_163 = arith.constant 0 : index
    %c0_164 = arith.constant 0 : index
    %240 = vector.load %arg23[%c0_163, %c0_164] : memref<8x8xf32, #tpu.memory_space<vmem>>, vector<8x8xf32>
    tpu.vector_store %arg23[%c0_163, %c0_164], %239 {strides = array<i32>} : memref<8x8xf32, #tpu.memory_space<vmem>>, vector<8x8xf32>,
    %c0_165 = arith.constant 0 : index
    %c0_166 = arith.constant 0 : index
    %241 = tpu.strided_load %arg23[%c0_165, %c0_166] {strides = array<i32: 2, 1>} : memref<8x8xf32, #tpu.memory_space<vmem>>, vector<4x8xf32>
    %c1_167 = arith.constant 1 : index
    %c0_168 = arith.constant 0 : index
    %242 = tpu.strided_load %arg23[%c1_167, %c0_168] {strides = array<i32: 2, 1>} : memref<8x8xf32, #tpu.memory_space<vmem>>, vector<4x8xf32>
    %243 = arith.maximumf %241, %242 : vector<4x8xf32>
    %cst_169 = arith.constant 5.000000e-01 : f32
    %244 = vector.broadcast %cst_169 : f32 to vector<4x8xf32>
    %245 = arith.mulf %244, %243 : vector<4x8xf32>
    %cst_170 = arith.constant 0.707106769 : f32
    %246 = vector.broadcast %cst_170 : f32 to vector<4x8xf32>
    %247 = arith.mulf %243, %246 : vector<4x8xf32>
    %248 = math.erf %247 : vector<4x8xf32>
    %cst_171 = arith.constant 1.000000e+00 : f32
    %249 = vector.broadcast %cst_171 : f32 to vector<4x8xf32>
    %250 = arith.addf %249, %248 : vector<4x8xf32>
    %251 = arith.mulf %245, %250 : vector<4x8xf32>
    %c0_172 = arith.constant 0 : index
    %c0_173 = arith.constant 0 : index
    %252 = vector.load %arg15[%c0_172, %c0_173] : memref<5x1xf32, #tpu.memory_space<vmem>>, vector<5x1xf32>
    %c0_174 = arith.constant 0 : index
    %c0_175 = arith.constant 0 : index
    %c0_176 = arith.constant 0 : index
    %253 = vector.load %arg14[%c0_174, %c0_175, %c0_176] : memref<8x5x4xf32, #tpu.memory_space<vmem>>, vector<1x5x4xf32>
    %254 = vector.shape_cast %253 : vector<1x5x4xf32> to vector<5x4xf32>
    %255 = vector.extract_strided_slice %251 {offsets = [0, 0], sizes = [4, 1], strides = [1, 1]} : vector<4x8xf32> to vector<4x1xf32>
    %cst_177 = arith.constant dense<0.000000e+00> : vector<5x1xf32>
    %256 = tpu.matmul %254, %255, %cst_177 {dimension_numbers = #tpu.dot_dimension_numbers<[1], [0], [0], [1], [0, 0, 1, 1], [], []>} : vector<5x4xf32>, vector<4x1xf32>, vector<5x1xf32> -> vector<5x1xf32>
    %257 = arith.addf %252, %256 : vector<5x1xf32>
    %c1_178 = arith.constant 1 : index
    %c0_179 = arith.constant 0 : index
    %c0_180 = arith.constant 0 : index
    %258 = vector.load %arg14[%c1_178, %c0_179, %c0_180] : memref<8x5x4xf32, #tpu.memory_space<vmem>>, vector<1x5x4xf32>
    %259 = vector.shape_cast %258 : vector<1x5x4xf32> to vector<5x4xf32>
    %260 = vector.extract_strided_slice %251 {offsets = [0, 1], sizes = [4, 1], strides = [1, 1]} : vector<4x8xf32> to vector<4x1xf32>
    %cst_181 = arith.constant dense<0.000000e+00> : vector<5x1xf32>
    %261 = tpu.matmul %259, %260, %cst_181 {dimension_numbers = #tpu.dot_dimension_numbers<[1], [0], [0], [1], [0, 0, 1, 1], [], []>} : vector<5x4xf32>, vector<4x1xf32>, vector<5x1xf32> -> vector<5x1xf32>
    %262 = arith.addf %257, %261 : vector<5x1xf32>
    %c2_182 = arith.constant 2 : index
    %c0_183 = arith.constant 0 : index
    %c0_184 = arith.constant 0 : index
    %263 = vector.load %arg14[%c2_182, %c0_183, %c0_184] : memref<8x5x4xf32, #tpu.memory_space<vmem>>, vector<1x5x4xf32>
    %264 = vector.shape_cast %263 : vector<1x5x4xf32> to vector<5x4xf32>
    %265 = vector.extract_strided_slice %251 {offsets = [0, 2], sizes = [4, 1], strides = [1, 1]} : vector<4x8xf32> to vector<4x1xf32>
    %cst_185 = arith.constant dense<0.000000e+00> : vector<5x1xf32>
    %266 = tpu.matmul %264, %265, %cst_185 {dimension_numbers = #tpu.dot_dimension_numbers<[1], [0], [0], [1], [0, 0, 1, 1], [], []>} : vector<5x4xf32>, vector<4x1xf32>, vector<5x1xf32> -> vector<5x1xf32>
    %267 = arith.addf %262, %266 : vector<5x1xf32>
    %c3_186 = arith.constant 3 : index
    %c0_187 = arith.constant 0 : index
    %c0_188 = arith.constant 0 : index
    %268 = vector.load %arg14[%c3_186, %c0_187, %c0_188] : memref<8x5x4xf32, #tpu.memory_space<vmem>>, vector<1x5x4xf32>
    %269 = vector.shape_cast %268 : vector<1x5x4xf32> to vector<5x4xf32>
    %270 = vector.extract_strided_slice %251 {offsets = [0, 3], sizes = [4, 1], strides = [1, 1]} : vector<4x8xf32> to vector<4x1xf32>
    %cst_189 = arith.constant dense<0.000000e+00> : vector<5x1xf32>
    %271 = tpu.matmul %269, %270, %cst_189 {dimension_numbers = #tpu.dot_dimension_numbers<[1], [0], [0], [1], [0, 0, 1, 1], [], []>} : vector<5x4xf32>, vector<4x1xf32>, vector<5x1xf32> -> vector<5x1xf32>
    %272 = arith.addf %267, %271 : vector<5x1xf32>
    %c4_190 = arith.constant 4 : index
    %c0_191 = arith.constant 0 : index
    %c0_192 = arith.constant 0 : index
    %273 = vector.load %arg14[%c4_190, %c0_191, %c0_192] : memref<8x5x4xf32, #tpu.memory_space<vmem>>, vector<1x5x4xf32>
    %274 = vector.shape_cast %273 : vector<1x5x4xf32> to vector<5x4xf32>
    %275 = vector.extract_strided_slice %251 {offsets = [0, 4], sizes = [4, 1], strides = [1, 1]} : vector<4x8xf32> to vector<4x1xf32>
    %cst_193 = arith.constant dense<0.000000e+00> : vector<5x1xf32>
    %276 = tpu.matmul %274, %275, %cst_193 {dimension_numbers = #tpu.dot_dimension_numbers<[1], [0], [0], [1], [0, 0, 1, 1], [], []>} : vector<5x4xf32>, vector<4x1xf32>, vector<5x1xf32> -> vector<5x1xf32>
    %277 = arith.addf %272, %276 : vector<5x1xf32>
    %c5_194 = arith.constant 5 : index
    %c0_195 = arith.constant 0 : index
    %c0_196 = arith.constant 0 : index
    %278 = vector.load %arg14[%c5_194, %c0_195, %c0_196] : memref<8x5x4xf32, #tpu.memory_space<vmem>>, vector<1x5x4xf32>
    %279 = vector.shape_cast %278 : vector<1x5x4xf32> to vector<5x4xf32>
    %280 = vector.extract_strided_slice %251 {offsets = [0, 5], sizes = [4, 1], strides = [1, 1]} : vector<4x8xf32> to vector<4x1xf32>
    %cst_197 = arith.constant dense<0.000000e+00> : vector<5x1xf32>
    %281 = tpu.matmul %279, %280, %cst_197 {dimension_numbers = #tpu.dot_dimension_numbers<[1], [0], [0], [1], [0, 0, 1, 1], [], []>} : vector<5x4xf32>, vector<4x1xf32>, vector<5x1xf32> -> vector<5x1xf32>
    %282 = arith.addf %277, %281 : vector<5x1xf32>
    %c6_198 = arith.constant 6 : index
    %c0_199 = arith.constant 0 : index
    %c0_200 = arith.constant 0 : index
    %283 = vector.load %arg14[%c6_198, %c0_199, %c0_200] : memref<8x5x4xf32, #tpu.memory_space<vmem>>, vector<1x5x4xf32>
    %284 = vector.shape_cast %283 : vector<1x5x4xf32> to vector<5x4xf32>
    %285 = vector.extract_strided_slice %251 {offsets = [0, 6], sizes = [4, 1], strides = [1, 1]} : vector<4x8xf32> to vector<4x1xf32>
    %cst_201 = arith.constant dense<0.000000e+00> : vector<5x1xf32>
    %286 = tpu.matmul %284, %285, %cst_201 {dimension_numbers = #tpu.dot_dimension_numbers<[1], [0], [0], [1], [0, 0, 1, 1], [], []>} : vector<5x4xf32>, vector<4x1xf32>, vector<5x1xf32> -> vector<5x1xf32>
    %287 = arith.addf %282, %286 : vector<5x1xf32>
    %c7_202 = arith.constant 7 : index
    %c0_203 = arith.constant 0 : index
    %c0_204 = arith.constant 0 : index
    %288 = vector.load %arg14[%c7_202, %c0_203, %c0_204] : memref<8x5x4xf32, #tpu.memory_space<vmem>>, vector<1x5x4xf32>
    %289 = vector.shape_cast %288 : vector<1x5x4xf32> to vector<5x4xf32>
    %290 = vector.extract_strided_slice %251 {offsets = [0, 7], sizes = [4, 1], strides = [1, 1]} : vector<4x8xf32> to vector<4x1xf32>
    %cst_205 = arith.constant dense<0.000000e+00> : vector<5x1xf32>
    %291 = tpu.matmul %289, %290, %cst_205 {dimension_numbers = #tpu.dot_dimension_numbers<[1], [0], [0], [1], [0, 0, 1, 1], [], []>} : vector<5x4xf32>, vector<4x1xf32>, vector<5x1xf32> -> vector<5x1xf32>
    %292 = arith.addf %287, %291 : vector<5x1xf32>
    %c0_206 = arith.constant 0 : index
    %c0_207 = arith.constant 0 : index
    %c0_208 = arith.constant 0 : index
    %293 = vector.load %arg16[%c0_206, %c0_207, %c0_208] : memref<1x5x1xf32, #tpu.memory_space<vmem>>, vector<1x5x1xf32>
    %294 = vector.shape_cast %293 : vector<1x5x1xf32> to vector<5x1xf32>
    %295 = vector.shape_cast %292 : vector<5x1xf32> to vector<1x5x1xf32>
    tpu.vector_store %arg16[%c0_206, %c0_207, %c0_208], %295 {strides = array<i32>} : memref<1x5x1xf32, #tpu.memory_space<vmem>>, vector<1x5x1xf32>,
    return
  }
  func.func @transform_0(%arg0: i32) -> (i32, i32, i32) {
    %c0_i32 = arith.constant 0 : i32
    %c0_i32_0 = arith.constant 0 : i32
    %c0_i32_1 = arith.constant 0 : i32
    return %arg0, %c0_i32, %c0_i32_0 : i32, i32, i32
  }
  func.func @transform_1(%arg0: i32) -> (i32, i32, i32) {
    %c0_i32 = arith.constant 0 : i32
    %c0_i32_0 = arith.constant 0 : i32
    %c0_i32_1 = arith.constant 0 : i32
    %c0_i32_2 = arith.constant 0 : i32
    return %c0_i32, %c0_i32_0, %c0_i32_1 : i32, i32, i32
  }
  func.func @transform_2(%arg0: i32) -> (i32, i32) {
    %c0_i32 = arith.constant 0 : i32
    %c0_i32_0 = arith.constant 0 : i32
    %c0_i32_1 = arith.constant 0 : i32
    return %c0_i32, %c0_i32_0 : i32, i32
  }
  func.func @transform_3(%arg0: i32) -> (i32, i32, i32) {
    %c0_i32 = arith.constant 0 : i32
    %c0_i32_0 = arith.constant 0 : i32
    %c0_i32_1 = arith.constant 0 : i32
    %c0_i32_2 = arith.constant 0 : i32
    return %c0_i32, %c0_i32_0, %c0_i32_1 : i32, i32, i32
  }
  func.func @transform_4(%arg0: i32) -> (i32, i32) {
    %c0_i32 = arith.constant 0 : i32
    %c0_i32_0 = arith.constant 0 : i32
    %c0_i32_1 = arith.constant 0 : i32
    return %c0_i32, %c0_i32_0 : i32, i32
  }
  func.func @transform_5(%arg0: i32) -> (i32, i32, i32) {
    %c0_i32 = arith.constant 0 : i32
    %c0_i32_0 = arith.constant 0 : i32
    %c0_i32_1 = arith.constant 0 : i32
    %c0_i32_2 = arith.constant 0 : i32
    return %c0_i32, %c0_i32_0, %c0_i32_1 : i32, i32, i32
  }
  func.func @transform_6(%arg0: i32) -> (i32, i32) {
    %c0_i32 = arith.constant 0 : i32
    %c0_i32_0 = arith.constant 0 : i32
    %c0_i32_1 = arith.constant 0 : i32
    return %c0_i32, %c0_i32_0 : i32, i32
  }
  func.func @transform_7(%arg0: i32) -> (i32, i32) {
    %c0_i32 = arith.constant 0 : i32
    %c0_i32_0 = arith.constant 0 : i32
    %c0_i32_1 = arith.constant 0 : i32
    return %c0_i32, %c0_i32_0 : i32, i32
  }
  func.func @transform_8(%arg0: i32) -> (i32, i32) {
    %c0_i32 = arith.constant 0 : i32
    %c0_i32_0 = arith.constant 0 : i32
    %c0_i32_1 = arith.constant 0 : i32
    return %c0_i32, %c0_i32_0 : i32, i32
  }
  func.func @transform_9(%arg0: i32) -> (i32, i32, i32) {
    %c0_i32 = arith.constant 0 : i32
    %c0_i32_0 = arith.constant 0 : i32
    %c0_i32_1 = arith.constant 0 : i32
    %c0_i32_2 = arith.constant 0 : i32
    return %c0_i32, %c0_i32_0, %c0_i32_1 : i32, i32, i32
  }
  func.func @transform_10(%arg0: i32) -> (i32, i32) {
    %c0_i32 = arith.constant 0 : i32
    %c0_i32_0 = arith.constant 0 : i32
    %c0_i32_1 = arith.constant 0 : i32
    return %c0_i32, %c0_i32_0 : i32, i32
  }
  func.func @transform_11(%arg0: i32) -> (i32, i32, i32) {
    %c0_i32 = arith.constant 0 : i32
    %c0_i32_0 = arith.constant 0 : i32
    %c0_i32_1 = arith.constant 0 : i32
    %c0_i32_2 = arith.constant 0 : i32
    return %c0_i32, %c0_i32_0, %c0_i32_1 : i32, i32, i32
  }
  func.func @transform_12(%arg0: i32) -> (i32, i32) {
    %c0_i32 = arith.constant 0 : i32
    %c0_i32_0 = arith.constant 0 : i32
    %c0_i32_1 = arith.constant 0 : i32
    return %c0_i32, %c0_i32_0 : i32, i32
  }
  func.func @transform_13(%arg0: i32) -> (i32, i32, i32) {
    %c0_i32 = arith.constant 0 : i32
    %c0_i32_0 = arith.constant 0 : i32
    %c0_i32_1 = arith.constant 0 : i32
    %c0_i32_2 = arith.constant 0 : i32
    return %c0_i32, %c0_i32_0, %c0_i32_1 : i32, i32, i32
  }
  func.func @transform_14(%arg0: i32) -> (i32, i32) {
    %c0_i32 = arith.constant 0 : i32
    %c0_i32_0 = arith.constant 0 : i32
    %c0_i32_1 = arith.constant 0 : i32
    return %c0_i32, %c0_i32_0 : i32, i32
  }
  func.func @transform_15(%arg0: i32) -> (i32, i32, i32) {
    %c0_i32 = arith.constant 0 : i32
    %c0_i32_0 = arith.constant 0 : i32
    %c0_i32_1 = arith.constant 0 : i32
    return %arg0, %c0_i32, %c0_i32_0 : i32, i32, i32
  }
}

</mosaic_0001>

<bundles_post_ra>
// kernel: tpu_custom_call.1
= control target key start
LH: loop header
LB: loop body
LE: loop exit
PB: predicated region body
PF: predicated region fallthrough
CT: control target
= control target key end

     0   :  { %s4464_s18 = smov 0   ;;  %s5153_s0 = inlined_call_operand.vmem [shape: f32[2,16,1], index: 0, kind: input, shape index: {}]   ;;  %s5154_s1 = inlined_call_operand.vmem [shape: f32[8,1,32], index: 1, kind: input, shape index: {}]   ;;  %s5155_s2 = inlined_call_operand.vmem [shape: f32[1,32], index: 2, kind: input, shape index: {}]   ;;  %s5156_s3 = inlined_call_operand.vmem [shape: f32[8,32,64], index: 3, kind: input, shape index: {}]   ;;  %s5157_s4 = inlined_call_operand.vmem [shape: f32[1,64], index: 4, kind: input, shape index: {}]   ;;  %s5158_s5 = inlined_call_operand.vmem [shape: f32[8,64,32], index: 5, kind: input, shape index: {}]   ;;  %s5159_s6 = inlined_call_operand.vmem [shape: f32[1,32], index: 6, kind: input, shape index: {}]   ;;  %s5160_s7 = inlined_call_operand.vmem [shape: f32[32,32], index: 7, kind: input, shape index: {}]   ;;  %s5161_s8 = inlined_call_operand.vmem [shape: f32[1,32], index: 8, kind: input, shape index: {}]   ;;  %s5162_s9 = inlined_call_operand.vmem [shape: f32[3,32,16], index: 9, kind: input, shape index: {}]   ;;  %s5163_s10 = inlined_call_operand.vmem [shape: f32[1,16], index: 10, kind: input, shape index: {}]   ;;  %s5164_s11 = inlined_call_operand.vmem [shape: f32[3,16,8], index: 11, kind: input, shape index: {}]   ;;  %s5165_s12 = inlined_call_operand.vmem [shape: f32[1,8], index: 12, kind: input, shape index: {}]   ;;  %s5166_s13 = inlined_call_operand.vmem [shape: f32[8,5,4], index: 13, kind: input, shape index: {}]   ;;  %s5167_s14 = inlined_call_operand.vmem [shape: f32[5,1], index: 14, kind: input, shape index: {}]   ;;  %s5168_s15 = inlined_call_operand.vmem [shape: f32[2,5,1], index: 15, kind: output, shape index: {}]  }
   0x1 LB: > { %s3607_s19 = sadd.s32 4294967295, %s4371_s18   ;;  %p3611_p0 = scmp.ge.s32.totalorder %s4371_s18, 1  ;;  %s4371_s18 = sphi %s4464_s18, %s25_s18  }
   0x2   : > { %p437_p1 = scmp.lt.s32.totalorder %s4371_s18, 3 }
   0x4   : > { %p438_p2 = pnand %p3611_p0, %p437_p1 }
   0x5   : > { %p484_p3 = scmp.lt.s32.totalorder (!%p438_p2), %s3607_s19, 1  ;;  %p3615_p4 = scmp.ne.s32.totalorder (!%p438_p2), %s3607_s19, 0 }
   0x6   : > { %441 = sbr.rel (%p438_p2) target bundleno = 1787 (0x6fb), region = 80 }
   0xb   : > { %s485_s20 = scalar_select %p484_p3, %s3607_s19, 1 }
   0xc   : > { %496 = sbr.rel (%p3615_p4) target bundleno = 28 (0x1c), region = 84 }
   0xd   : > { %s3801_s21 = sshll.u32 %s485_s20, 4  ;;  %s3614_s22 = sshll.u32 %s485_s20, 3 }
   0xe   : > { %s4475_s25 = scalar_lea.vmem %s5153_s0, %s3801_s21  ;;  %s4480_s28 = scalar_lea.vmem %s5168_s15, %s3614_s22 }
  0x11   : > { %vm497_vm0 = vcmask 7168   ;;  %vm500_vm1 = vcmask 6144   ;;  %vm502_vm2 = vcmask 261120   ;;  %v4373_v0 = vmov 0.0  }
  0x12   : > { %498 = vst.msk [vmem:[#allocation2] sm:$0xff] %vm497_vm0, %v4373_v0  ;;  %499 = vst.msk [vmem:[#allocation2 + $0x8] sm:$0xff] %vm497_vm0, %v4373_v0  ;;  %vm505_vm3 = vcmask 260096   ;;  %vm507_vm4 = vcmask 523264   ;;  %vm510_vm5 = vcmask 522240   ;;  %vm514_vm6 = vcmask 254976  }
  0x13   : > { %501 = vst.msk [vmem:[#allocation2 + $0x10] sm:$0x7f] %vm500_vm1, %v4373_v0  ;;  %vm516_vm7 = vcmask 130048   ;;  %vm518_vm8 = vcmask 123904  }
  0x14   : > { %503 = vst.msk [vmem:[#allocation3] sm:$0xff] %vm502_vm2, %v4373_v0  ;;  %504 = vst.msk [vmem:[#allocation3 + $0x8] sm:$0xff] %vm502_vm2, %v4373_v0 }
  0x15   : > { %512 = vst.msk [vmem:[#allocation5] sm:$0xff] %vm502_vm2, %v4373_v0  ;;  %513 = vst.msk [vmem:[#allocation5 + $0x8] sm:$0xff] %vm502_vm2, %v4373_v0 }
  0x16   : > { %506 = vst.msk [vmem:[#allocation3 + $0x10] sm:$0x7f] %vm505_vm3, %v4373_v0 }
  0x17   : > { %508 = vst.msk [vmem:[#allocation4] sm:$0xff] %vm507_vm4, %v4373_v0  ;;  %509 = vst.msk [vmem:[#allocation4 + $0x8] sm:$0xff] %vm507_vm4, %v4373_v0 }
  0x18   : > { %511 = vst.msk [vmem:[#allocation4 + $0x10] sm:$0x7f] %vm510_vm5, %v4373_v0 }
  0x19   : > { %515 = vst.msk [vmem:[#allocation5 + $0x10] sm:$0x3] %vm514_vm6, %v4373_v0 }
  0x1a   : > { %517 = vst.msk [vmem:[#allocation7] sm:$0xff] %vm516_vm7, %v4373_v0 }
  0x1b   : > { %519 = vst.msk [vmem:[#allocation7 + $0x8] sm:$0x3] %vm518_vm8, %v4373_v0 }
  0x1c PF: > { %v520_v1 = vld [vmem:[%s4475_s25] sm:$0xff]  ;;  %vm522_vm9 = vcmask 7168   ;;  %v521_v2 = vld [vmem:[%s4475_s25 + $0x8] sm:$0xff]  ;;  %v4374_v3 = vmov 0   ;;  %v748_v7 = vld [vmem:[%s5156_s3 + $0x18] sm:$0xff]  ;;  %vm566_vm10 = vcmask 1046528  }
  0x1d   : > { %4343 = vset.pattern.permute.xlu0 %v4374_v3  ;;  %523 = vst.msk [vmem:[#allocation2 + $0x3] sm:$0xff] %vm522_vm9, %v520_v1  ;;  %4344 = vset.pattern.permute.xlu1 %v4374_v3  ;;  %524 = vst.msk [vmem:[#allocation2 + $0xb] sm:$0xff] %vm522_vm9, %v521_v2  ;;  %v747_v8 = vld [vmem:[%s5156_s3 + $0x10] sm:$0xff]  ;;  %v3635_v9 = vld [vmem:[%s5156_s3 + $0x38] sm:$0xff]  ;;  %vm590_vm11 = vcmask 1045504   ;;  %vm614_vm12 = vcmask 1044480  }
  0x1e   : > { %3990 = vmatprep.subr.mxu1 %v748_v7  ;;  %3979 = vmatprep.subr.mxu0 %v3635_v9  ;;  %v3634_v10 = vld [vmem:[%s5156_s3 + $0x30] sm:$0xff]  ;;  %v746_v11 = vld [vmem:[%s5156_s3 + $0x8] sm:$0xff]  ;;  %v745_v13 = vld [vmem:[%s5156_s3] sm:$0xff]  ;;  %vm638_vm13 = vcmask 1043456   ;;  %vm662_vm14 = vcmask 1042432   ;;  %vm686_vm15 = vcmask 1041408  }
  0x1f   : > { %3991 = vmatpush3.msra.mxu1 %v748_v7  ;;  %3980 = vmatpush3.msra.mxu0 %v3635_v9  ;;  %v3633_v12 = vld [vmem:[%s5156_s3 + $0x28] sm:$0xff]  ;;  %v4508_v14 = vld [vmem:[%s5156_s3 + $0x78] sm:$0xff]  ;;  %v3632_v15 = vld [vmem:[%s5156_s3 + $0x20] sm:$0xff]  ;;  %vm710_vm0 = vcmask 1040384   ;;  %vm739_vm1 = vcmask 261120   ;;  %vm1485_vm2 = vcmask 523264  }
  0x20   : > { %3992 = vmatprep.subr.mxu1 %v747_v8  ;;  %3981 = vmatprep.subr.mxu0 %v3634_v10  ;;  %v4517_v16 = vld [vmem:[%s5156_s3 + $0x58] sm:$0xff]  ;;  %v3618_v17 = vld [vmem:[%s5154_s1 + $0x1] ss:$0 sm:$0xff]  ;;  %v3620_v19 = vld [vmem:[%s5154_s1 + $0x2] ss:$0 sm:$0xff]  ;;  %vm4376_vm3 = vmmov 0  }
  0x21   : > { %3993 = vmatpush3.msra.mxu1 %v747_v8  ;;  %3982 = vmatpush3.msra.mxu0 %v3634_v10  ;;  %v3622_v21 = vld [vmem:[%s5154_s1 + $0x3] ss:$0 sm:$0xff]  ;;  %v3624_v22 = vld [vmem:[%s5154_s1 + $0x4] ss:$0 sm:$0xff]  ;;  %v3616_v24 = vld [vmem:[%s5154_s1] ss:$0 sm:$0xff] }
  0x22   : > { %3994 = vmatprep.subr.mxu1 %v746_v11  ;;  %3983 = vmatprep.subr.mxu0 %v3633_v12  ;;  %v3626_v35 = vld [vmem:[%s5154_s1 + $0x5] ss:$0 sm:$0xff]  ;;  %v3628_v44 = vld [vmem:[%s5154_s1 + $0x6] ss:$0 sm:$0xff]  ;;  %v3630_v61 = vld [vmem:[%s5154_s1 + $0x7] ss:$0 sm:$0xff] }
  0x23   : > { %3995 = vmatpush3.msra.mxu1 %v746_v11  ;;  %3984 = vmatpush3.msra.mxu0 %v3633_v12  ;;  %vm2645_vm4 = vcmask 130048   ;;  %vm2901_vm5 = vcmask 64512   ;;  %vm2914_vm6 = vcmask 31744   ;;  %s4377_s21 = smov 126   ;;  %s4378_s22 = smov 127   ;;  %vm3552_vm7 = vcmask 4096  }
  0x24   : > { %v525_v4 = vld [vmem:[#allocation2] sm:$0xff]  ;;  %v527_v5 = vld [vmem:[#allocation2 + $0x10] sm:$0x7f]  ;;  %v526_v6 = vld [vmem:[#allocation2 + $0x8] sm:$0xff]  ;;  %3996 = vmatprep.subr.mxu1 %v745_v13  ;;  %3985 = vmatprep.subr.mxu0 %v3632_v15  ;;  %s4379_s23 = smov 124   ;;  %s4380_s24 = smov 125  }
  0x25   : > { %531 = vperm.xlu0 %4343, %v525_v4   ;;  %551 = vperm.xlu1 %4344, %v527_v5   ;;  %s4381_s25 = smov 122   ;;  %s4382_s26 = smov 123  }
  0x26   : > { %3997 = vmatpush3.msra.mxu1 %v745_v13  ;;  %3986 = vmatpush3.msra.mxu0 %v3632_v15  ;;  %s4383_s27 = smov 121  }
  0x27   : > { %4012 = vmatprep.subr.mxu1 %v4508_v14  ;;  %4001 = vmatprep.subr.mxu0 %v4517_v16 }
  0x29   : > { %536 = vperm.xlu0 %4343, %v526_v6  }
  0xa0   : > { %v532_v18 = vpop.permute.xlu0 %531  ;;  %v552_v20 = vpop.permute.xlu1 %551 }
  0xa1   : > { %v560_v23 = vmul.f32 %v3618_v17, %v532_v18  ;;  %v562_v25 = vmul.f32 %v3618_v17, %v552_v20  ;;  %v584_v26 = vmul.f32 %v3620_v19, %v532_v18  ;;  %v586_v27 = vmul.f32 %v3620_v19, %v552_v20 }
  0xa2   : > { %v608_v28 = vmul.f32 %v3622_v21, %v532_v18  ;;  %v610_v29 = vmul.f32 %v3622_v21, %v552_v20  ;;  %v632_v30 = vmul.f32 %v3624_v22, %v532_v18  ;;  %v634_v32 = vmul.f32 %v3624_v22, %v552_v20 }
  0xa3   : > { %v545_v33 = vmul.f32 %v3616_v24, %v532_v18  ;;  %v567_v34 = vrot.slane %v560_v23, 1  ;;  %v570_v36 = vrot.slane %v562_v25, 1  ;;  %v591_v37 = vrot.slane %v584_v26, 2 }
  0xa4   : > { %v537_v31 = vpop.permute.xlu0 %536  ;;  %v594_v38 = vrot.slane %v586_v27, 2  ;;  %v615_v40 = vrot.slane %v608_v28, 3  ;;  %v618_v41 = vrot.slane %v610_v29, 3  ;;  %v639_v42 = vrot.slane %v632_v30, 4 }
  0xa5   : > { %v561_v39 = vmul.f32 %v3618_v17, %v537_v31  ;;  %v585_v43 = vmul.f32 %v3620_v19, %v537_v31  ;;  %v642_v45 = vrot.slane %v634_v32, 4  ;;  %v609_v47 = vmul.f32 %v3622_v21, %v537_v31 }
  0xa6   : > { %v633_v48 = vmul.f32 %v3624_v22, %v537_v31  ;;  %v656_v49 = vmul.f32 %v3626_v35, %v532_v18  ;;  %v658_v50 = vmul.f32 %v3626_v35, %v552_v20  ;;  %v546_v51 = vmul.f32 %v3616_v24, %v537_v31 }
  0xa7   : > { %v568_v46 = vrot.slane %v561_v39, 1  ;;  %v592_v52 = vrot.slane %v585_v43, 2  ;;  %v616_v55 = vrot.slane %v609_v47, 3  ;;  %v657_v56 = vmul.f32 %v3626_v35, %v537_v31 }
  0xa8   : > { %v680_v57 = vmul.f32 %v3628_v44, %v532_v18  ;;  %v682_v58 = vmul.f32 %v3628_v44, %v552_v20  ;;  %v640_v0 = vrot.slane %v633_v48, 4  ;;  %v681_v1 = vmul.f32 %v3628_v44, %v537_v31 }
  0xa9   : > { %v569_v53 = vsel %vm566_vm10, %v567_v34, %v568_v46  ;;  %v571_v54 = vsel %vm566_vm10, %v568_v46, %v570_v36  ;;  %v593_v62 = vsel %vm590_vm11, %v591_v37, %v592_v52  ;;  %v595_v63 = vsel %vm590_vm11, %v592_v52, %v594_v38  ;;  %v3631_v34 = vld [vmem:[%s5155_s2] ss:$0 sm:$0xff] }
  0xaa   : > { %v574_v59 = vadd.f32 %v569_v53, %v545_v33  ;;  %v575_v60 = vadd.f32 %v571_v54, %v546_v51  ;;  %v666_v2 = vrot.slane %v658_v50, 5  ;;  %v706_v3 = vmul.f32 %v3630_v61, %v552_v20  ;;  %v3648_v53 = vld [vmem:[%s5156_s3 + $0x70] sm:$0xff] }
  0xab   : > { %v617_v6 = vsel %vm614_vm12, %v615_v40, %v616_v55  ;;  %v619_v7 = vsel %vm614_vm12, %v616_v55, %v618_v41  ;;  %v664_v8 = vrot.slane %v657_v56, 5  ;;  %v705_v9 = vmul.f32 %v3630_v61, %v537_v31 }
  0xac   : > { %v598_v4 = vadd.f32 %v593_v62, %v574_v59  ;;  %v599_v5 = vadd.f32 %v595_v63, %v575_v60  ;;  %v663_v10 = vrot.slane %v656_v49, 5  ;;  %v704_v11 = vmul.f32 %v3630_v61, %v532_v18 }
  0xad   : > { %v690_v15 = vrot.slane %v682_v58, 6  ;;  %v641_v17 = vsel %vm638_vm13, %v639_v42, %v640_v0  ;;  %v643_v19 = vsel %vm638_vm13, %v640_v0, %v642_v45  ;;  %v688_v21 = vrot.slane %v681_v1, 6  ;;  %v3647_v1 = vld [vmem:[%s5156_s3 + $0x68] sm:$0xff] }
  0xae   : > { %v622_v12 = vadd.f32 %v617_v6, %v598_v4  ;;  %v623_v13 = vadd.f32 %v619_v7, %v599_v5  ;;  %v687_v22 = vrot.slane %v680_v57, 6  ;;  %v714_v24 = vrot.slane %v706_v3, 7  ;;  %v3646_v3 = vld [vmem:[%s5156_s3 + $0x60] sm:$0xff]  ;;  %v3641_v4 = vld [vmem:[%s5156_s3 + $0x48] sm:$0xff] }
  0xaf   : > { %v665_v25 = vsel %vm662_vm14, %v663_v10, %v664_v8  ;;  %v667_v26 = vsel %vm662_vm14, %v664_v8, %v666_v2  ;;  %v712_v27 = vrot.slane %v705_v9, 7  ;;  %v711_v29 = vrot.slane %v704_v11, 7  ;;  %v3640_v8 = vld [vmem:[%s5156_s3 + $0x40] sm:$0xff]  ;;  %v3660_v11 = vld [vmem:[%s5156_s3 + $0xb0] sm:$0xff] }
  0xb0   : > { %v646_v20 = vadd.f32 %v641_v17, %v622_v12  ;;  %v647_v23 = vadd.f32 %v643_v19, %v623_v13  ;;  %v689_v30 = vsel %vm686_vm15, %v687_v22, %v688_v21  ;;  %v691_v31 = vsel %vm686_vm15, %v688_v21, %v690_v15  ;;  %v3655_v17 = vld [vmem:[%s5156_s3 + $0x98] sm:$0xff]  ;;  %v3659_v21 = vld [vmem:[%s5156_s3 + $0xa8] sm:$0xff]  ;;  %v3654_v22 = vld [vmem:[%s5156_s3 + $0x90] sm:$0xff] }
  0xb1   : > { %v713_v35 = vsel %vm710_vm0, %v711_v29, %v712_v27  ;;  %v715_v36 = vsel %vm710_vm0, %v712_v27, %v714_v24  ;;  %v3653_v24 = vld [vmem:[%s5156_s3 + $0x88] sm:$0xff] }
  0xb2   : > { %v670_v18 = vadd.f32 %v665_v25, %v646_v20  ;;  %v671_v28 = vadd.f32 %v667_v26, %v647_v23  ;;  %v3658_v23 = vld [vmem:[%s5156_s3 + $0xa0] sm:$0xff]  ;;  %v3673_v26 = vld [vmem:[%s5156_s3 + $0xf8] sm:$0xff] }
  0xb4   : > { %v694_v32 = vadd.f32 %v689_v30, %v670_v18  ;;  %v695_v33 = vadd.f32 %v691_v31, %v671_v28  ;;  %v3652_v28 = vld [vmem:[%s5156_s3 + $0x80] sm:$0xff]  ;;  %v3672_v31 = vld [vmem:[%s5156_s3 + $0xf0] sm:$0xff] }
  0xb6   : > { %v718_v37 = vadd.f32 %v713_v35, %v694_v32  ;;  %v719_v38 = vadd.f32 %v715_v36, %v695_v33  ;;  %v3667_v35 = vld [vmem:[%s5156_s3 + $0xd8] sm:$0xff] }
  0xb8   : > { %v727_v39 = vadd.f32 %v3631_v34, %v718_v37  ;;  %v728_v40 = vadd.f32 %v3631_v34, %v719_v38  ;;  %v3671_v37 = vld [vmem:[%s5156_s3 + $0xe8] sm:$0xff]  ;;  %v3666_v38 = vld [vmem:[%s5156_s3 + $0xd0] sm:$0xff] }
  0xba   : > { %v731_v41 = vmul.f32 0.70710677, %v727_v39  ;;  %v732_v42 = vmul.f32 0.70710677, %v728_v40  ;;  %v729_v45 = vmul.f32 0.5, %v727_v39  ;;  %v730_v47 = vmul.f32 0.5, %v728_v40 }
  0xbb   : > { %v3670_v40 = vld [vmem:[%s5156_s3 + $0xe0] sm:$0xff] }
  0xbc   : > { %4345 = verf.f32 %v731_v41  ;;  %v3665_v41 = vld [vmem:[%s5156_s3 + $0xc8] sm:$0xff] }
  0xbd   : > { %4347 = verf.f32 %v732_v42 }
  0xc9   : > { %v4346_v43 = vpop.eup %4345 }
  0xca   : > { %v4348_v44 = vpop.eup %4347  ;;  %v735_v46 = vadd.f32 1.0, %v4346_v43  ;;  %v3664_v43 = vld [vmem:[%s5156_s3 + $0xc0] sm:$0xff] }
  0xcb   : > { %v736_v48 = vadd.f32 1.0, %v4348_v44 }
  0xcc   : > { %v737_v49 = vmul.f32 %v735_v46, %v729_v45 }
  0xcd   : > { %v738_v50 = vmul.f32 %v736_v48, %v730_v47  ;;  %v1498_v47 = vld [vmem:[%s5158_s5 + $0x38] sm:$0xff]  ;;  %v1497_v48 = vld [vmem:[%s5158_s5 + $0x30] sm:$0xff] }
  0xce   : > { %740 = vst.msk [vmem:[#allocation3 + $0x3] sm:$0xff] %vm739_vm1, %v737_v49  ;;  %v3684_v49 = vld [vmem:[%s5158_s5 + $0x78] sm:$0xff] }
  0xcf   : > { %741 = vst.msk [vmem:[#allocation3 + $0xb] sm:$0xff] %vm739_vm1, %v738_v50  ;;  %v1496_v50 = vld [vmem:[%s5158_s5 + $0x28] sm:$0xff] }
  0xd5   : > { %v4563_v51 = vld [vmem:[#allocation3] sm:$0xff] }
  0xd6   : > { %3998 = vmatprep.mubr.msk.f32.mxu1 %vm739_vm1, %v4563_v51  ;;  %v4567_v52 = vld [vmem:[#allocation3 + $0x8] sm:$0xff]  ;;  %v757_v54 = vrot.slane %v4563_v51, 1  ;;  %v1016_v55 = vrot.slane %v4563_v51, 3  ;;  %v4574_v56 = vld [vmem:[#allocation3 + $0x10] sm:$0x7f]  ;;  %v925_v60 = vrot.slane %v4563_v51, 2 }
  0xd7   : > { %3999 = vmatmul.mubr.msk.f32.vlgmr.msra.gmra.mxu1 %vm739_vm1, %v4567_v52  ;;  %v758_v57 = vrot.slane %v4567_v52, 1  ;;  %v1017_v58 = vrot.slane %v4567_v52, 3  ;;  %v760_v59 = vrot.slane %v4574_v56, 1  ;;  %v926_v61 = vrot.slane %v4567_v52, 2 }
  0xd8   : > { %4013 = vmatpush3.msra.mxu1 %v4508_v14  ;;  %v3642_v14 = vld [vmem:[%s5156_s3 + $0x50] sm:$0xff]  ;;  %v1019_v5 = vrot.slane %v4574_v56, 3  ;;  %v1198_v6 = vrot.slane %v4563_v51, 5  ;;  %v1199_v7 = vrot.slane %v4567_v52, 5  ;;  %v928_v9 = vrot.slane %v4574_v56, 2 }
  0xd9   : > { %4014 = vmatprep.subr.mxu1 %v3648_v53  ;;  %v759_v62 = vsel %vm566_vm10, %v757_v54, %v758_v57  ;;  %v1018_v63 = vsel %vm614_vm12, %v1016_v55, %v1017_v58  ;;  %v761_v0 = vsel %vm566_vm10, %v758_v57, %v760_v59  ;;  %v927_v2 = vsel %vm590_vm11, %v925_v60, %v926_v61  ;;  %v1494_v54 = vld [vmem:[%s5158_s5 + $0x18] sm:$0xff]  ;;  %v3681_v55 = vld [vmem:[%s5158_s5 + $0x60] sm:$0xff]  ;;  %v3679_v59 = vld [vmem:[%s5158_s5 + $0x50] sm:$0xff] }
  0xda   : > { %3987 = vmatprep.mubr.msk.f32.mxu0 %vm739_vm1, %v759_v62  ;;  %4015 = vmatpush3.msra.mxu1 %v3648_v53  ;;  %v1020_v10 = vsel %vm614_vm12, %v1017_v58, %v1019_v5  ;;  %v1107_v12 = vrot.slane %v4563_v51, 4  ;;  %v1108_v13 = vrot.slane %v4567_v52, 4  ;;  %v1200_v15 = vsel %vm662_vm14, %v1198_v6, %v1199_v7  ;;  %v3682_v53 = vld [vmem:[%s5158_s5 + $0x68] sm:$0xff]  ;;  %v3680_v57 = vld [vmem:[%s5158_s5 + $0x58] sm:$0xff]  ;;  %v1491_v60 = vld [vmem:[%s5158_s5] sm:$0xff] }
  0xdb   : > { %4020 = vmatprep.mubr.msk.f32.mxu1 %vm739_vm1, %v1018_v63  ;;  %3988 = vmatmul.mubr.msk.f32.vlgmr.msra.gmra.mxu0 %vm739_vm1, %v761_v0  ;;  %v929_v19 = vsel %vm590_vm11, %v926_v61, %v928_v9  ;;  %v1201_v25 = vrot.slane %v4574_v56, 5  ;;  %v1380_v27 = vrot.slane %v4563_v51, 7  ;;  %v1381_v18 = vrot.slane %v4567_v52, 7  ;;  %v1492_v58 = vld [vmem:[%s5158_s5 + $0x8] sm:$0xff]  ;;  %v4738_v62 = vld [vmem:[%s5158_s5 + $0xf8] sm:$0xff]  ;;  %v3677_v63 = vld [vmem:[%s5158_s5 + $0x40] sm:$0xff] }
  0xdc   : > { %4002 = vmatpush3.msra.mxu0 %v4517_v16  ;;  %4016 = vmatprep.subr.mxu1 %v3647_v1  ;;  %v3661_v16 = vld [vmem:[%s5156_s3 + $0xb8] sm:$0xff]  ;;  %v1109_v20 = vsel %vm638_vm13, %v1107_v12, %v1108_v13  ;;  %v1110_v29 = vrot.slane %v4574_v56, 4  ;;  %v1289_v32 = vrot.slane %v4563_v51, 6  ;;  %v1290_v33 = vrot.slane %v4567_v52, 6  ;;  %v3683_v51 = vld [vmem:[%s5158_s5 + $0x70] sm:$0xff]  ;;  %v1495_v52 = vld [vmem:[%s5158_s5 + $0x20] sm:$0xff] }
  0xdd   : > { %4003 = vmatprep.subr.mxu0 %v3642_v14  ;;  %4009 = vmatprep.mubr.msk.f32.mxu0 %vm739_vm1, %v927_v2  ;;  %v1202_v30 = vsel %vm662_vm14, %v1199_v7, %v1201_v25  ;;  %v1382_v34 = vsel %vm710_vm0, %v1380_v27, %v1381_v18  ;;  %v1383_v42 = vrot.slane %v4574_v56, 7  ;;  %v1292_v44 = vrot.slane %v4574_v56, 6  ;;  %v1493_v56 = vld [vmem:[%s5158_s5 + $0x10] sm:$0xff]  ;;  %v3678_v61 = vld [vmem:[%s5158_s5 + $0x48] sm:$0xff]  ;;  %v4747_v0 = vld [vmem:[%s5158_s5 + $0xb8] sm:$0xff] }
  0xde   : > { %4017 = vmatpush3.msra.mxu1 %v3647_v1  ;;  %4004 = vmatpush3.msra.mxu0 %v3642_v14  ;;  %v1111_v36 = vsel %vm638_vm13, %v1108_v13, %v1110_v29  ;;  %v1291_v39 = vsel %vm686_vm15, %v1289_v32, %v1290_v33  ;;  %v3676_v27 = vld [vmem:[%s5157_s4] ss:$0 sm:$0xff] }
  0xdf   : > { %4018 = vmatprep.subr.mxu1 %v3646_v3  ;;  %4005 = vmatprep.subr.mxu0 %v3641_v4  ;;  %v1384_v45 = vsel %vm710_vm0, %v1381_v18, %v1383_v42  ;;  %v1293_v46 = vsel %vm686_vm15, %v1290_v33, %v1292_v44 }
  0xe0   : > { %4019 = vmatpush3.msra.mxu1 %v3646_v3  ;;  %4006 = vmatpush3.msra.mxu0 %v3641_v4 }
  0xe1   : > { %4021 = vmatmul.mubr.msk.f32.vlgmr.msra.gmra.mxu1 %vm739_vm1, %v1020_v10  ;;  %4034 = vmatprep.subr.mxu1 %v3661_v16 }
  0xe2   : > { %4007 = vmatprep.subr.mxu0 %v3640_v8  ;;  %4035 = vmatpush3.msra.mxu1 %v3661_v16 }
  0xe3   : > { %4042 = vmatprep.mubr.msk.f32.mxu1 %vm739_vm1, %v1200_v15  ;;  %4008 = vmatpush3.msra.mxu0 %v3640_v8 }
  0xe4   : > { %4036 = vmatprep.subr.mxu1 %v3660_v11  ;;  %4010 = vmatmul.mubr.msk.f32.vlgmr.msra.gmra.mxu0 %vm739_vm1, %v929_v19 }
  0xe5   : > { %4023 = vmatprep.subr.mxu0 %v3655_v17  ;;  %4037 = vmatpush3.msra.mxu1 %v3660_v11 }
  0xe6   : > { %4024 = vmatpush3.msra.mxu0 %v3655_v17  ;;  %4031 = vmatprep.mubr.msk.f32.mxu0 %vm739_vm1, %v1109_v20 }
  0xe7   : > { %4038 = vmatprep.subr.mxu1 %v3659_v21  ;;  %4025 = vmatprep.subr.mxu0 %v3654_v22 }
  0xe8   : > { %4039 = vmatpush3.msra.mxu1 %v3659_v21  ;;  %4026 = vmatpush3.msra.mxu0 %v3654_v22 }
  0xe9   : > { %4040 = vmatprep.subr.mxu1 %v3658_v23  ;;  %4027 = vmatprep.subr.mxu0 %v3653_v24 }
  0xea   : > { %4041 = vmatpush3.msra.mxu1 %v3658_v23  ;;  %4028 = vmatpush3.msra.mxu0 %v3653_v24 }
  0xeb   : > { %4043 = vmatmul.mubr.msk.f32.vlgmr.msra.gmra.mxu1 %vm739_vm1, %v1202_v30  ;;  %4056 = vmatprep.subr.mxu1 %v3673_v26 }
  0xec   : > { %4029 = vmatprep.subr.mxu0 %v3652_v28  ;;  %4057 = vmatpush3.msra.mxu1 %v3673_v26 }
  0xed   : > { %4064 = vmatprep.mubr.msk.f32.mxu1 %vm739_vm1, %v1382_v34  ;;  %4030 = vmatpush3.msra.mxu0 %v3652_v28 }
  0xee   : > { %4058 = vmatprep.subr.mxu1 %v3672_v31  ;;  %4032 = vmatmul.mubr.msk.f32.vlgmr.msra.gmra.mxu0 %vm739_vm1, %v1111_v36 }
  0xef   : > { %4045 = vmatprep.subr.mxu0 %v3667_v35  ;;  %4059 = vmatpush3.msra.mxu1 %v3672_v31 }
  0xf0   : > { %4046 = vmatpush3.msra.mxu0 %v3667_v35  ;;  %4053 = vmatprep.mubr.msk.f32.mxu0 %vm739_vm1, %v1291_v39 }
  0xf1   : > { %4060 = vmatprep.subr.mxu1 %v3671_v37  ;;  %4047 = vmatprep.subr.mxu0 %v3666_v38 }
  0xf2   : > { %4061 = vmatpush3.msra.mxu1 %v3671_v37  ;;  %4048 = vmatpush3.msra.mxu0 %v3666_v38 }
  0xf3   : > { %4062 = vmatprep.subr.mxu1 %v3670_v40  ;;  %4049 = vmatprep.subr.mxu0 %v3665_v41 }
  0xf4   : > { %4063 = vmatpush3.msra.mxu1 %v3670_v40  ;;  %4050 = vmatpush3.msra.mxu0 %v3665_v41 }
  0xf5   : > { %4065 = vmatmul.mubr.msk.f32.vlgmr.msra.gmra.mxu1 %vm739_vm1, %v1384_v45  ;;  %4051 = vmatprep.subr.mxu0 %v3664_v43 }
  0xf6   : > { %4052 = vmatpush3.msra.mxu0 %v3664_v43  ;;  %4086 = vmatprep.subr.mxu1 %v1498_v47 }
  0xf7   : > { %4054 = vmatmul.mubr.msk.f32.vlgmr.msra.gmra.mxu0 %vm739_vm1, %v1293_v46  ;;  %4087 = vmatpush3.msra.mxu1 %v1498_v47 }
  0xf8   : > { %4088 = vmatprep.subr.mxu1 %v1497_v48  ;;  %4067 = vmatprep.subr.mxu0 %v3684_v49 }
  0xf9   : > { %4089 = vmatpush3.msra.mxu1 %v1497_v48  ;;  %4068 = vmatpush3.msra.mxu0 %v3684_v49  ;;  %v3705_v48 = vld [vmem:[%s5158_s5 + $0xf0] sm:$0xff] }
  0xfa   : > { %4090 = vmatprep.subr.mxu1 %v1496_v50  ;;  %4069 = vmatprep.subr.mxu0 %v3683_v51 }
  0xfb   : > { %4091 = vmatpush3.msra.mxu1 %v1496_v50  ;;  %4070 = vmatpush3.msra.mxu0 %v3683_v51 }
  0xfc   : > { %4092 = vmatprep.subr.mxu1 %v1495_v52  ;;  %4071 = vmatprep.subr.mxu0 %v3682_v53 }
  0xfd   : > { %4093 = vmatpush3.msra.mxu1 %v1495_v52  ;;  %4072 = vmatpush3.msra.mxu0 %v3682_v53 }
  0xfe   : > { %4094 = vmatprep.subr.mxu1 %v1494_v54  ;;  %4073 = vmatprep.subr.mxu0 %v3681_v55 }
  0xff   : > { %4095 = vmatpush3.msra.mxu1 %v1494_v54  ;;  %4074 = vmatpush3.msra.mxu0 %v3681_v55 }
 0x100   : > { %4096 = vmatprep.subr.mxu1 %v1493_v56  ;;  %4075 = vmatprep.subr.mxu0 %v3680_v57 }
 0x101   : > { %4097 = vmatpush3.msra.mxu1 %v1493_v56  ;;  %4076 = vmatpush3.msra.mxu0 %v3680_v57 }
 0x102   : > { %4098 = vmatprep.subr.mxu1 %v1492_v58  ;;  %4077 = vmatprep.subr.mxu0 %v3679_v59 }
 0x103   : > { %4099 = vmatpush3.msra.mxu1 %v1492_v58  ;;  %4078 = vmatpush3.msra.mxu0 %v3679_v59  ;;  %v3704_v58 = vld [vmem:[%s5158_s5 + $0xe8] sm:$0xff]  ;;  %v3695_v59 = vld [vmem:[%s5158_s5 + $0xb0] sm:$0xff] }
 0x104   : > { %4100 = vmatprep.subr.mxu1 %v1491_v60  ;;  %4079 = vmatprep.subr.mxu0 %v3678_v61 }
 0x105   : > { %4101 = vmatpush3.msra.mxu1 %v1491_v60  ;;  %4080 = vmatpush3.msra.mxu0 %v3678_v61  ;;  %v3703_v61 = vld [vmem:[%s5158_s5 + $0xe0] sm:$0xff] }
 0x106   : > { %4124 = vmatprep.subr.mxu1 %v4738_v62  ;;  %4081 = vmatprep.subr.mxu0 %v3677_v63 }
 0x107   : > { %4082 = vmatpush3.msra.mxu0 %v3677_v63  ;;  %v3702_v63 = vld [vmem:[%s5158_s5 + $0xd8] sm:$0xff] }
 0x108   : > { %4105 = vmatprep.subr.mxu0 %v4747_v0 }
 0x197   : > { %v4000_v14 = vpop.f32.mrf.mxu1 }
 0x199   : > { %v911_v4 = vpop.f32.mrf.mxu1 }
 0x19b   : > { %v3989_v1 = vpop.f32.mrf.mxu0 }
 0x19c   : > { %v917_v5 = vadd.f32 %v4000_v14, %v3989_v1  ;;  %v3693_v1 = vld [vmem:[%s5158_s5 + $0xa0] sm:$0xff]  ;;  %v3692_v14 = vld [vmem:[%s5158_s5 + $0x98] sm:$0xff] }
 0x19d   : > { %v832_v2 = vpop.f32.mrf.mxu0 }
 0x19e   : > { %v912_v7 = vadd.f32 %v911_v4, %v832_v2  ;;  %v3700_v2 = vld [vmem:[%s5158_s5 + $0xc8] sm:$0xff]  ;;  %v3699_v4 = vld [vmem:[%s5158_s5 + $0xc0] sm:$0xff] }
 0x1a1   : > { %v4022_v16 = vpop.f32.mrf.mxu1 }
 0x1a3   : > { %v1091_v11 = vpop.f32.mrf.mxu1 }
 0x1a4   : > { %v4011_v3 = vpop.f32.mrf.mxu0 }
 0x1a5   : > { %v1010_v8 = vadd.f32 %v4011_v3, %v917_v5  ;;  %v3691_v3 = vld [vmem:[%s5158_s5 + $0x90] sm:$0xff]  ;;  %v3690_v5 = vld [vmem:[%s5158_s5 + $0x88] sm:$0xff] }
 0x1a6   : > { %v1000_v6 = vpop.f32.mrf.mxu0 }
 0x1a7   : > { %v1009_v9 = vadd.f32 %v1000_v6, %v912_v7  ;;  %v1101_v12 = vadd.f32 %v4022_v16, %v1010_v8  ;;  %v3726_v8 = vld [vmem:[%s5158_s5 + $0x178] sm:$0xff] }
 0x1a9   : > { %v1100_v19 = vadd.f32 %v1091_v11, %v1009_v9  ;;  %v3689_v9 = vld [vmem:[%s5158_s5 + $0x80] sm:$0xff]  ;;  %v3725_v11 = vld [vmem:[%s5158_s5 + $0x170] sm:$0xff] }
 0x1ab   : > { %v4044_v13 = vpop.f32.mrf.mxu1 }
 0x1ad   : > { %v1273_v22 = vpop.f32.mrf.mxu1 }
 0x1ae   : > { %v4033_v10 = vpop.f32.mrf.mxu0 }
 0x1af   : > { %v1192_v17 = vadd.f32 %v4033_v10, %v1101_v12 }
 0x1b0   : > { %v1182_v15 = vpop.f32.mrf.mxu0 }
 0x1b1   : > { %v1191_v21 = vadd.f32 %v1182_v15, %v1100_v19  ;;  %v1283_v20 = vadd.f32 %v4044_v13, %v1192_v17  ;;  %v3716_v15 = vld [vmem:[%s5158_s5 + $0x138] sm:$0xff] }
 0x1b3   : > { %v1282_v26 = vadd.f32 %v1273_v22, %v1191_v21  ;;  %v3724_v22 = vld [vmem:[%s5158_s5 + $0x168] sm:$0xff] }
 0x1b5   : > { %v4066_v23 = vpop.f32.mrf.mxu1 }
 0x1b7   : > { %v4055_v24 = vpop.f32.mrf.mxu0  ;;  %v1455_v30 = vpop.f32.mrf.mxu1 }
 0x1b8   : > { %v1374_v25 = vadd.f32 %v4055_v24, %v1283_v20  ;;  %v3715_v20 = vld [vmem:[%s5158_s5 + $0x130] sm:$0xff]  ;;  %v3723_v24 = vld [vmem:[%s5158_s5 + $0x160] sm:$0xff] }
 0x1b9   : > { %v1364_v18 = vpop.f32.mrf.mxu0 }
 0x1ba   : > { %v1465_v28 = vadd.f32 %v4066_v23, %v1374_v25  ;;  %v1373_v29 = vadd.f32 %v1364_v18, %v1282_v26  ;;  %v3714_v25 = vld [vmem:[%s5158_s5 + $0x128] sm:$0xff]  ;;  %v3722_v26 = vld [vmem:[%s5158_s5 + $0x158] sm:$0xff]  ;;  %v3721_v18 = vld [vmem:[%s5158_s5 + $0x150] sm:$0xff] }
 0x1bc   : > { %v1474_v31 = vadd.f32 %v3676_v27, %v1465_v28  ;;  %v1464_v32 = vadd.f32 %v1455_v30, %v1373_v29  ;;  %v3712_v28 = vld [vmem:[%s5158_s5 + $0x118] sm:$0xff]  ;;  %v3720_v29 = vld [vmem:[%s5158_s5 + $0x148] sm:$0xff]  ;;  %v3711_v30 = vld [vmem:[%s5158_s5 + $0x110] sm:$0xff] }
 0x1be   : > { %v1478_v33 = vmul.f32 0.70710677, %v1474_v31  ;;  %v1473_v34 = vadd.f32 %v3676_v27, %v1464_v32  ;;  %v1476_v37 = vmul.f32 0.5, %v1474_v31  ;;  %v3713_v27 = vld [vmem:[%s5158_s5 + $0x120] sm:$0xff]  ;;  %v3710_v32 = vld [vmem:[%s5158_s5 + $0x108] sm:$0xff] }
 0x1bf   : > { %v3719_v31 = vld [vmem:[%s5158_s5 + $0x140] sm:$0xff] }
 0x1c0   : > { %4349 = verf.f32 %v1478_v33  ;;  %v1477_v35 = vmul.f32 0.70710677, %v1473_v34  ;;  %v1475_v41 = vmul.f32 0.5, %v1473_v34 }
 0x1c2   : > { %4351 = verf.f32 %v1477_v35 }
 0x1cd   : > { %v4350_v36 = vpop.eup %4349 }
 0x1ce   : > { %v1482_v38 = vadd.f32 1.0, %v4350_v36  ;;  %v3746_v36 = vld [vmem:[%s5158_s5 + $0x1f8] sm:$0xff] }
 0x1cf   : > { %v4352_v39 = vpop.eup %4351 }
 0x1d0   : > { %v1484_v40 = vmul.f32 %v1482_v38, %v1476_v37  ;;  %v1481_v42 = vadd.f32 1.0, %v4352_v39  ;;  %v3709_v37 = vld [vmem:[%s5158_s5 + $0x100] sm:$0xff]  ;;  %v3745_v39 = vld [vmem:[%s5158_s5 + $0x1f0] sm:$0xff] }
 0x1d2   : > { %1487 = vst.msk [vmem:[#allocation4 + $0xb] sm:$0xff] %vm1485_vm2, %v1484_v40  ;;  %v1483_v43 = vmul.f32 %v1481_v42, %v1475_v41  ;;  %v3736_v42 = vld [vmem:[%s5158_s5 + $0x1b8] sm:$0xff] }
 0x1d4   : > { %1486 = vst.msk [vmem:[#allocation4 + $0x3] sm:$0xff] %vm1485_vm2, %v1483_v43 }
 0x1d9   : > { %v4755_v44 = vld [vmem:[#allocation4 + $0x10] sm:$0x7f] }
 0x1da   : > { %v1514_v47 = vrot.slane %v4755_v44, 1  ;;  %v1781_v16 = vrot.slane %v4755_v44, 3  ;;  %v1686_v13 = vrot.slane %v4755_v44, 2  ;;  %v1971_v33 = vrot.slane %v4755_v44, 5 }
 0x1db   : > { %v4757_v45 = vld [vmem:[#allocation4] sm:$0xff]  ;;  %v4759_v46 = vld [vmem:[#allocation4 + $0x8] sm:$0xff]  ;;  %v1876_v41 = vrot.slane %v4755_v44, 4 }
 0x1dc   : > { %4102 = vmatprep.mubr.msk.f32.mxu1 %vm1485_vm2, %v4757_v45  ;;  %v1511_v49 = vrot.slane %v4757_v45, 1  ;;  %v1512_v50 = vrot.slane %v4759_v46, 1  ;;  %v1778_v51 = vrot.slane %v4757_v45, 3  ;;  %v1779_v52 = vrot.slane %v4759_v46, 3 }
 0x1dd   : > { %4103 = vmatmul.mubr.msk.f32.vlgmr.msra.gmra.mxu1 %vm1485_vm2, %v4759_v46  ;;  %v1683_v53 = vrot.slane %v4757_v45, 2  ;;  %v1684_v54 = vrot.slane %v4759_v46, 2  ;;  %v1968_v6 = vrot.slane %v4757_v45, 5  ;;  %v1969_v7 = vrot.slane %v4759_v46, 5 }
 0x1de   : > { %4125 = vmatpush3.msra.mxu1 %v4738_v62  ;;  %v1513_v55 = vsel %vm566_vm10, %v1511_v49, %v1512_v50  ;;  %v1780_v56 = vsel %vm614_vm12, %v1778_v51, %v1779_v52  ;;  %v1515_v57 = vsel %vm566_vm10, %v1512_v50, %v1514_v47  ;;  %v3694_v62 = vld [vmem:[%s5158_s5 + $0xa8] sm:$0xff]  ;;  %v1782_v10 = vsel %vm614_vm12, %v1779_v52, %v1781_v16  ;;  %v3743_v51 = vld [vmem:[%s5158_s5 + $0x1e0] sm:$0xff] }
 0x1df   : > { %4126 = vmatprep.subr.mxu1 %v3705_v48  ;;  %4083 = vmatprep.mubr.msk.f32.mxu0 %vm1485_vm2, %v1513_v55  ;;  %v1685_v60 = vsel %vm590_vm11, %v1683_v53, %v1684_v54  ;;  %v1970_v12 = vsel %vm662_vm14, %v1968_v6, %v1969_v7  ;;  %v1873_v17 = vrot.slane %v4757_v45, 4  ;;  %v1874_v19 = vrot.slane %v4759_v46, 4  ;;  %v3744_v49 = vld [vmem:[%s5158_s5 + $0x1e8] sm:$0xff]  ;;  %v3742_v53 = vld [vmem:[%s5158_s5 + $0x1d8] sm:$0xff]  ;;  %v3741_v55 = vld [vmem:[%s5158_s5 + $0x1d0] sm:$0xff] }
 0x1e0   : > { %4127 = vmatpush3.msra.mxu1 %v3705_v48  ;;  %4140 = vmatprep.mubr.msk.f32.mxu1 %vm1485_vm2, %v1780_v56  ;;  %v1687_v21 = vsel %vm590_vm11, %v1684_v54, %v1686_v13  ;;  %v2158_v34 = vrot.slane %v4757_v45, 7  ;;  %v2159_v35 = vrot.slane %v4759_v46, 7  ;;  %v1972_v38 = vsel %vm662_vm14, %v1969_v7, %v1971_v33  ;;  %v3734_v52 = vld [vmem:[%s5158_s5 + $0x1a8] sm:$0xff]  ;;  %v3733_v54 = vld [vmem:[%s5158_s5 + $0x1a0] sm:$0xff]  ;;  %v3732_v56 = vld [vmem:[%s5158_s5 + $0x198] sm:$0xff] }
 0x1e1   : > { %4084 = vmatmul.mubr.msk.f32.vlgmr.msra.gmra.mxu0 %vm1485_vm2, %v1515_v57  ;;  %4128 = vmatprep.subr.mxu1 %v3704_v58  ;;  %v1875_v23 = vsel %vm638_vm13, %v1873_v17, %v1874_v19  ;;  %v2063_v43 = vrot.slane %v4757_v45, 6  ;;  %v2064_v47 = vrot.slane %v4759_v46, 6  ;;  %v1877_v48 = vsel %vm638_vm13, %v1874_v19, %v1876_v41  ;;  %v3735_v45 = vld [vmem:[%s5158_s5 + $0x1b0] sm:$0xff]  ;;  %v3740_v57 = vld [vmem:[%s5158_s5 + $0x1c8] sm:$0xff] }
 0x1e2   : > { %4106 = vmatpush3.msra.mxu0 %v4747_v0  ;;  %4121 = vmatprep.mubr.msk.f32.mxu0 %vm1485_vm2, %v1685_v60  ;;  %v3701_v0 = vld [vmem:[%s5158_s5 + $0xd0] sm:$0xff]  ;;  %v2160_v40 = vsel %vm710_vm0, %v2158_v34, %v2159_v35  ;;  %v3730_v60 = vld [vmem:[%s5158_s5 + $0x188] sm:$0xff] }
 0x1e3   : > { %4107 = vmatprep.subr.mxu0 %v3695_v59  ;;  %4129 = vmatpush3.msra.mxu1 %v3704_v58  ;;  %v2065_v50 = vsel %vm686_vm15, %v2063_v43, %v2064_v47  ;;  %v3731_v58 = vld [vmem:[%s5158_s5 + $0x190] sm:$0xff] }
 0x1e4   : > { %4108 = vmatpush3.msra.mxu0 %v3695_v59  ;;  %4130 = vmatprep.subr.mxu1 %v3703_v61  ;;  %v3739_v59 = vld [vmem:[%s5158_s5 + $0x1c0] sm:$0xff]  ;;  %v2265_v46 = vld [vmem:[%s5160_s7 + $0x10] sm:$0xff] }
 0x1e5   : > { %4109 = vmatprep.subr.mxu0 %v3694_v62  ;;  %4131 = vmatpush3.msra.mxu1 %v3703_v61  ;;  %v2161_v61 = vrot.slane %v4755_v44, 7 }
 0x1e6   : > { %4110 = vmatpush3.msra.mxu0 %v3694_v62  ;;  %4132 = vmatprep.subr.mxu1 %v3702_v63  ;;  %v3729_v62 = vld [vmem:[%s5158_s5 + $0x180] sm:$0xff] }
 0x1e7   : > { %4111 = vmatprep.subr.mxu0 %v3693_v1  ;;  %4133 = vmatpush3.msra.mxu1 %v3702_v63  ;;  %v2162_v63 = vsel %vm710_vm0, %v2159_v35, %v2161_v61 }
 0x1e8   : > { %4112 = vmatpush3.msra.mxu0 %v3693_v1  ;;  %4134 = vmatprep.subr.mxu1 %v3701_v0  ;;  %v2066_v1 = vrot.slane %v4755_v44, 6  ;;  %v2264_v44 = vld [vmem:[%s5160_s7 + $0x8] sm:$0xff] }
 0x1e9   : > { %4113 = vmatprep.subr.mxu0 %v3692_v14  ;;  %4135 = vmatpush3.msra.mxu1 %v3701_v0 }
 0x1ea   : > { %4114 = vmatpush3.msra.mxu0 %v3692_v14  ;;  %4136 = vmatprep.subr.mxu1 %v3700_v2  ;;  %v2067_v0 = vsel %vm686_vm15, %v2064_v47, %v2066_v1  ;;  %v2266_v14 = vld [vmem:[%s5160_s7 + $0x18] sm:$0xff] }
 0x1eb   : > { %4115 = vmatprep.subr.mxu0 %v3691_v3  ;;  %4137 = vmatpush3.msra.mxu1 %v3700_v2  ;;  %v2263_v2 = vld [vmem:[%s5160_s7] sm:$0xff] }
 0x1ec   : > { %4116 = vmatpush3.msra.mxu0 %v3691_v3  ;;  %4138 = vmatprep.subr.mxu1 %v3699_v4 }
 0x1ed   : > { %4117 = vmatprep.subr.mxu0 %v3690_v5  ;;  %4139 = vmatpush3.msra.mxu1 %v3699_v4 }
 0x1ee   : > { %4118 = vmatpush3.msra.mxu0 %v3690_v5  ;;  %4141 = vmatmul.mubr.msk.f32.vlgmr.msra.gmra.mxu1 %vm1485_vm2, %v1782_v10 }
 0x1ef   : > { %4162 = vmatprep.subr.mxu1 %v3726_v8  ;;  %4119 = vmatprep.subr.mxu0 %v3689_v9 }
 0x1f0   : > { %4163 = vmatpush3.msra.mxu1 %v3726_v8  ;;  %4178 = vmatprep.mubr.msk.f32.mxu1 %vm1485_vm2, %v1970_v12 }
 0x1f1   : > { %4120 = vmatpush3.msra.mxu0 %v3689_v9  ;;  %4164 = vmatprep.subr.mxu1 %v3725_v11 }
 0x1f2   : > { %4122 = vmatmul.mubr.msk.f32.vlgmr.msra.gmra.mxu0 %vm1485_vm2, %v1687_v21  ;;  %4143 = vmatprep.subr.mxu0 %v3716_v15 }
 0x1f3   : > { %4165 = vmatpush3.msra.mxu1 %v3725_v11  ;;  %4144 = vmatpush3.msra.mxu0 %v3716_v15 }
 0x1f4   : > { %4159 = vmatprep.mubr.msk.f32.mxu0 %vm1485_vm2, %v1875_v23  ;;  %4166 = vmatprep.subr.mxu1 %v3724_v22 }
 0x1f5   : > { %4145 = vmatprep.subr.mxu0 %v3715_v20  ;;  %4167 = vmatpush3.msra.mxu1 %v3724_v22 }
 0x1f6   : > { %4146 = vmatpush3.msra.mxu0 %v3715_v20  ;;  %4168 = vmatprep.subr.mxu1 %v3723_v24 }
 0x1f7   : > { %4147 = vmatprep.subr.mxu0 %v3714_v25  ;;  %4169 = vmatpush3.msra.mxu1 %v3723_v24 }
 0x1f8   : > { %4148 = vmatpush3.msra.mxu0 %v3714_v25  ;;  %4170 = vmatprep.subr.mxu1 %v3722_v26 }
 0x1f9   : > { %4149 = vmatprep.subr.mxu0 %v3713_v27  ;;  %4171 = vmatpush3.msra.mxu1 %v3722_v26 }
 0x1fa   : > { %4150 = vmatpush3.msra.mxu0 %v3713_v27  ;;  %4172 = vmatprep.subr.mxu1 %v3721_v18 }
 0x1fb   : > { %4151 = vmatprep.subr.mxu0 %v3712_v28  ;;  %4173 = vmatpush3.msra.mxu1 %v3721_v18 }
 0x1fc   : > { %4152 = vmatpush3.msra.mxu0 %v3712_v28  ;;  %4174 = vmatprep.subr.mxu1 %v3720_v29 }
 0x1fd   : > { %4153 = vmatprep.subr.mxu0 %v3711_v30  ;;  %4175 = vmatpush3.msra.mxu1 %v3720_v29  ;;  %v3749_v29 = vld [vmem:[%s5159_s6] ss:$0 sm:$0xff] }
 0x1fe   : > { %4154 = vmatpush3.msra.mxu0 %v3711_v30  ;;  %4176 = vmatprep.subr.mxu1 %v3719_v31 }
 0x1ff   : > { %4155 = vmatprep.subr.mxu0 %v3710_v32  ;;  %4177 = vmatpush3.msra.mxu1 %v3719_v31 }
 0x200   : > { %4156 = vmatpush3.msra.mxu0 %v3710_v32  ;;  %4179 = vmatmul.mubr.msk.f32.vlgmr.msra.gmra.mxu1 %vm1485_vm2, %v1972_v38 }
 0x201   : > { %4200 = vmatprep.subr.mxu1 %v3746_v36  ;;  %4157 = vmatprep.subr.mxu0 %v3709_v37 }
 0x202   : > { %4201 = vmatpush3.msra.mxu1 %v3746_v36  ;;  %4216 = vmatprep.mubr.msk.f32.mxu1 %vm1485_vm2, %v2160_v40 }
 0x203   : > { %4158 = vmatpush3.msra.mxu0 %v3709_v37  ;;  %4202 = vmatprep.subr.mxu1 %v3745_v39 }
 0x204   : > { %4160 = vmatmul.mubr.msk.f32.vlgmr.msra.gmra.mxu0 %vm1485_vm2, %v1877_v48  ;;  %4181 = vmatprep.subr.mxu0 %v3736_v42 }
 0x205   : > { %4203 = vmatpush3.msra.mxu1 %v3745_v39  ;;  %4182 = vmatpush3.msra.mxu0 %v3736_v42 }
 0x206   : > { %4197 = vmatprep.mubr.msk.f32.mxu0 %vm1485_vm2, %v2065_v50  ;;  %4204 = vmatprep.subr.mxu1 %v3744_v49  ;;  %v3756_v50 = vld [vmem:[%s5162_s9 + $0x38] sm:$0xff] }
 0x207   : > { %4183 = vmatprep.subr.mxu0 %v3735_v45  ;;  %4205 = vmatpush3.msra.mxu1 %v3744_v49 }
 0x208   : > { %4184 = vmatpush3.msra.mxu0 %v3735_v45  ;;  %4206 = vmatprep.subr.mxu1 %v3743_v51  ;;  %v2373_v45 = vld [vmem:[%s5162_s9 + $0x18] sm:$0xff] }
 0x209   : > { %4185 = vmatprep.subr.mxu0 %v3734_v52  ;;  %4207 = vmatpush3.msra.mxu1 %v3743_v51  ;;  %v2372_v51 = vld [vmem:[%s5162_s9 + $0x10] sm:$0xff] }
 0x20a   : > { %4186 = vmatpush3.msra.mxu0 %v3734_v52  ;;  %4208 = vmatprep.subr.mxu1 %v3742_v53  ;;  %v3755_v52 = vld [vmem:[%s5162_s9 + $0x30] sm:$0xff] }
 0x20b   : > { %4187 = vmatprep.subr.mxu0 %v3733_v54  ;;  %4209 = vmatpush3.msra.mxu1 %v3742_v53  ;;  %v2371_v53 = vld [vmem:[%s5162_s9 + $0x8] sm:$0xff] }
 0x20c   : > { %4188 = vmatpush3.msra.mxu0 %v3733_v54  ;;  %4210 = vmatprep.subr.mxu1 %v3741_v55  ;;  %v3754_v54 = vld [vmem:[%s5162_s9 + $0x28] sm:$0xff] }
 0x20d   : > { %4189 = vmatprep.subr.mxu0 %v3732_v56  ;;  %4211 = vmatpush3.msra.mxu1 %v3741_v55  ;;  %v2370_v55 = vld [vmem:[%s5162_s9] sm:$0xff] }
 0x20e   : > { %4190 = vmatpush3.msra.mxu0 %v3732_v56  ;;  %4212 = vmatprep.subr.mxu1 %v3740_v57  ;;  %v3753_v56 = vld [vmem:[%s5162_s9 + $0x20] sm:$0xff] }
 0x20f   : > { %4191 = vmatprep.subr.mxu0 %v3731_v58  ;;  %4213 = vmatpush3.msra.mxu1 %v3740_v57  ;;  %v3764_v57 = vld [vmem:[%s5162_s9 + $0x58] sm:$0xff] }
 0x210   : > { %4192 = vmatpush3.msra.mxu0 %v3731_v58  ;;  %4214 = vmatprep.subr.mxu1 %v3739_v59  ;;  %v3750_v58 = vld [vmem:[%s5161_s8] ss:$0 sm:$0xff] }
 0x211   : > { %4193 = vmatprep.subr.mxu0 %v3730_v60  ;;  %4215 = vmatpush3.msra.mxu1 %v3739_v59 }
 0x212   : > { %4194 = vmatpush3.msra.mxu0 %v3730_v60  ;;  %4217 = vmatmul.mubr.msk.f32.vlgmr.msra.gmra.mxu1 %vm1485_vm2, %v2162_v63 }
 0x213   : > { %4195 = vmatprep.subr.mxu0 %v3729_v62  ;;  %4230 = vmatprep.subr.mxu1 %v3756_v50 }
 0x214   : > { %4196 = vmatpush3.msra.mxu0 %v3729_v62  ;;  %4231 = vmatpush3.msra.mxu1 %v3756_v50 }
 0x215   : > { %4198 = vmatmul.mubr.msk.f32.vlgmr.msra.gmra.mxu0 %vm1485_vm2, %v2067_v0  ;;  %4219 = vmatprep.subr.mxu0 %v2266_v14 }
 0x216   : > { %4220 = vmatpush3.msra.mxu0 %v2266_v14  ;;  %4232 = vmatprep.subr.mxu1 %v3755_v52 }
 0x217   : > { %4221 = vmatprep.subr.mxu0 %v2265_v46  ;;  %4233 = vmatpush3.msra.mxu1 %v3755_v52 }
 0x218   : > { %4222 = vmatpush3.msra.mxu0 %v2265_v46  ;;  %4234 = vmatprep.subr.mxu1 %v3754_v54 }
 0x219   : > { %4223 = vmatprep.subr.mxu0 %v2264_v44  ;;  %4235 = vmatpush3.msra.mxu1 %v3754_v54 }
 0x21a   : > { %4224 = vmatpush3.msra.mxu0 %v2264_v44  ;;  %4236 = vmatprep.subr.mxu1 %v3753_v56 }
 0x21b   : > { %4225 = vmatprep.subr.mxu0 %v2263_v2  ;;  %4237 = vmatpush3.msra.mxu1 %v3753_v56 }
 0x21c   : > { %4226 = vmatpush3.msra.mxu0 %v2263_v2  ;;  %4252 = vmatprep.subr.mxu1 %v3764_v57 }
 0x21d   : > { %4241 = vmatprep.subr.mxu0 %v2373_v45 }
 0x29d   : > { %v4104_v4 = vpop.f32.mrf.mxu1 }
 0x29f   : > { %v1665_v6 = vpop.f32.mrf.mxu1 }
 0x2a1   : > { %v4085_v3 = vpop.f32.mrf.mxu0 }
 0x2a2   : > { %v1671_v7 = vadd.f32 %v4104_v4, %v4085_v3 }
 0x2a3   : > { %v1586_v5 = vpop.f32.mrf.mxu0 }
 0x2a4   : > { %v1666_v10 = vadd.f32 %v1665_v6, %v1586_v5 }
 0x2ae   : > { %v4142_v8 = vpop.f32.mrf.mxu1 }
 0x2b0   : > { %v1853_v15 = vpop.f32.mrf.mxu1 }
 0x2b2   : > { %v4123_v16 = vpop.f32.mrf.mxu0 }
 0x2b3   : > { %v1768_v11 = vadd.f32 %v4123_v16, %v1671_v7 }
 0x2b4   : > { %v1758_v9 = vpop.f32.mrf.mxu0 }
 0x2b5   : > { %v1767_v13 = vadd.f32 %v1758_v9, %v1666_v10  ;;  %v1863_v17 = vadd.f32 %v4142_v8, %v1768_v11 }
 0x2b7   : > { %v1862_v20 = vadd.f32 %v1853_v15, %v1767_v13 }
 0x2c0   : > { %v4180_v19 = vpop.f32.mrf.mxu1 }
 0x2c2   : > { %v2043_v24 = vpop.f32.mrf.mxu1 }
 0x2c4   : > { %v4161_v12 = vpop.f32.mrf.mxu0 }
 0x2c5   : > { %v1958_v22 = vadd.f32 %v4161_v12, %v1863_v17  ;;  %v3763_v17 = vld [vmem:[%s5162_s9 + $0x50] sm:$0xff] }
 0x2c6   : > { %v1948_v21 = vpop.f32.mrf.mxu0 }
 0x2c7   : > { %v1957_v23 = vadd.f32 %v1948_v21, %v1862_v20  ;;  %v2053_v25 = vadd.f32 %v4180_v19, %v1958_v22  ;;  %v3762_v21 = vld [vmem:[%s5162_s9 + $0x48] sm:$0xff]  ;;  %v3761_v22 = vld [vmem:[%s5162_s9 + $0x40] sm:$0xff] }
 0x2c9   : > { %v2052_v28 = vadd.f32 %v2043_v24, %v1957_v23  ;;  %v2661_v24 = vld [vmem:[%s5164_s11 + $0x8] sm:$0xff] }
 0x2d2   : > { %v4218_v26 = vpop.f32.mrf.mxu1 }
 0x2d4   : > { %v2233_v33 = vpop.f32.mrf.mxu1 }
 0x2d5   : > { %v4199_v27 = vpop.f32.mrf.mxu0 }
 0x2d6   : > { %v2148_v18 = vadd.f32 %v4199_v27, %v2053_v25  ;;  %v3769_v25 = vld [vmem:[%s5164_s11 + $0x18] sm:$0xff]  ;;  %v2660_v27 = vld [vmem:[%s5164_s11] sm:$0xff] }
 0x2d7   : > { %v2138_v30 = vpop.f32.mrf.mxu0 }
 0x2d8   : > { %v2243_v31 = vadd.f32 %v4218_v26, %v2148_v18  ;;  %v2147_v32 = vadd.f32 %v2138_v30, %v2052_v28  ;;  %v4375_v26 = vmov 0.0   ;;  %v3768_v18 = vld [vmem:[%s5164_s11 + $0x10] sm:$0xff] }
 0x2da   : > { %v2252_v34 = vadd.f32 %v3749_v29, %v2243_v31  ;;  %v2242_v35 = vadd.f32 %v2233_v33, %v2147_v32 }
 0x2dc   : > { %v2256_v36 = vmul.f32 0.70710677, %v2252_v34  ;;  %v2251_v37 = vadd.f32 %v3749_v29, %v2242_v35  ;;  %v2254_v47 = vmul.f32 0.5, %v2252_v34  ;;  %v3767_v34 = vld [vmem:[%s5163_s10] ss:$0 sm:$0xff] }
 0x2de   : > { %4353 = verf.f32 %v2256_v36  ;;  %v2255_v38 = vmul.f32 0.70710677, %v2251_v37  ;;  %v2253_v42 = vmul.f32 0.5, %v2251_v37 }
 0x2e0   : > { %4355 = verf.f32 %v2255_v38 }
 0x2eb   : > { %v4354_v39 = vpop.eup %4353 }
 0x2ec   : > { %v2260_v41 = vadd.f32 1.0, %v4354_v39 }
 0x2ed   : > { %v4356_v40 = vpop.eup %4355 }
 0x2ee   : > { %v2259_v43 = vadd.f32 1.0, %v4356_v40  ;;  %v2262_v49 = vmul.f32 %v2260_v41, %v2254_v47 }
 0x2f0   : > { %v2261_v48 = vmul.f32 %v2259_v43, %v2253_v42 }
 0x2f2   : > { %4227 = vmatprep.mubr.msk.f32.mxu0 %vm739_vm1, %v2261_v48 }
 0x2f3   : > { %4228 = vmatmul.mubr.msk.f32.vlgmr.msra.gmra.mxu0 %vm739_vm1, %v2262_v49 }
 0x2f4   : > { %4242 = vmatpush3.msra.mxu0 %v2373_v45 }
 0x2f5   : > { %4243 = vmatprep.subr.mxu0 %v2372_v51 }
 0x2f6   : > { %4244 = vmatpush3.msra.mxu0 %v2372_v51 }
 0x2f7   : > { %4245 = vmatprep.subr.mxu0 %v2371_v53 }
 0x2f8   : > { %4246 = vmatpush3.msra.mxu0 %v2371_v53 }
 0x2f9   : > { %4247 = vmatprep.subr.mxu0 %v2370_v55 }
 0x2fa   : > { %4248 = vmatpush3.msra.mxu0 %v2370_v55  ;;  %v3773_v55 = vld [vmem:[%s5164_s11 + $0x28] sm:$0xff] }
 0x2fb   : > { %4263 = vmatprep.subr.mxu0 %v4375_v26 }
 0x3b3   : > { %v4229_v59 = vpop.f32.mrf.mxu0 }
 0x3b4   : > { %v2352_v60 = vadd.f32 %v4229_v59, %v3750_v58  ;;  %v3772_v59 = vld [vmem:[%s5164_s11 + $0x20] sm:$0xff] }
 0x3b5   : > { %v2346_v61 = vpop.f32.mrf.mxu0 }
 0x3b6   : > { %v2358_v62 = vmul.f32 0.70710677, %v2352_v60  ;;  %v2347_v63 = vadd.f32 %v3750_v58, %v2346_v61  ;;  %v2356_v14 = vmul.f32 0.5, %v2352_v60 }
 0x3b8   : > { %4357 = verf.f32 %v2358_v62  ;;  %v2357_v1 = vmul.f32 0.70710677, %v2347_v63  ;;  %v2355_v3 = vmul.f32 0.5, %v2347_v63 }
 0x3ba   : > { %4359 = verf.f32 %v2357_v1 }
 0x3c5   : > { %v4358_v0 = vpop.eup %4357 }
 0x3c6   : > { %v2362_v46 = vadd.f32 1.0, %v4358_v0 }
 0x3c7   : > { %v4360_v44 = vpop.eup %4359 }
 0x3c8   : > { %v2364_v2 = vmul.f32 %v2362_v46, %v2356_v14  ;;  %v2361_v4 = vadd.f32 1.0, %v4360_v44  ;;  %v3775_v46 = vld [vmem:[%s5165_s12] ss:$0 sm:$0xff] }
 0x3ca   : > { %2366 = vst.msk [vmem:[#allocation5 + $0x9] sm:$0xff] %vm739_vm1, %v2364_v2  ;;  %v2363_v5 = vmul.f32 %v2361_v4, %v2355_v3 }
 0x3cc   : > { %2365 = vst.msk [vmem:[#allocation5 + $0x1] sm:$0xff] %vm739_vm1, %v2363_v5 }
 0x3d1   : > { %v2369_v16 = vld [vmem:[#allocation5 + $0x10] sm:$0x3] }
 0x3d2   : > { %v2385_v8 = vrot.slane %v2369_v16, 1  ;;  %v2553_v20 = vrot.slane %v2369_v16, 2 }
 0x3d3   : > { %v2367_v6 = vld [vmem:[#allocation5] sm:$0xff]  ;;  %v2368_v7 = vld [vmem:[#allocation5 + $0x8] sm:$0xff] }
 0x3d4   : > { %v2382_v9 = vrot.slane %v2367_v6, 1  ;;  %4249 = vmatprep.mubr.msk.f32.mxu0 %vm739_vm1, %v2367_v6  ;;  %v2550_v10 = vrot.slane %v2367_v6, 2  ;;  %v2383_v11 = vrot.slane %v2368_v7, 1  ;;  %v2551_v12 = vrot.slane %v2368_v7, 2 }
 0x3d5   : > { %4250 = vmatmul.mubr.msk.f32.vlgmr.msra.gmra.mxu0 %vm739_vm1, %v2368_v7 }
 0x3d6   : > { %v2384_v13 = vsel %vm566_vm10, %v2382_v9, %v2383_v11  ;;  %v2386_v15 = vsel %vm566_vm10, %v2383_v11, %v2385_v8  ;;  %v2552_v19 = vsel %vm590_vm11, %v2550_v10, %v2551_v12  ;;  %v2554_v23 = vsel %vm590_vm11, %v2551_v12, %v2553_v20  ;;  %4264 = vmatpush3.msra.mxu0 %v3769_v25  ;;  %v2913_v11 = vld [vmem:[%s5166_s13] sm:$0x1f]  ;;  %v3778_v12 = vld [vmem:[%s5166_s13 + $0x8] sm:$0x1f] }
 0x3d7   : > { %4238 = vmatprep.mubr.msk.f32.mxu1 %vm739_vm1, %v2384_v13  ;;  %4265 = vmatprep.subr.mxu0 %v4375_v26  ;;  %v3787_v20 = vld [vmem:[%s5166_s13 + $0x20] sm:$0x1f] }
 0x3d8   : > { %4239 = vmatmul.mubr.msk.f32.vlgmr.msra.gmra.mxu1 %vm739_vm1, %v2386_v15  ;;  %4267 = vmatprep.mubr.msk.f32.mxu0 %vm4376_vm3, %v4375_v26 }
 0x3d9   : > { %4253 = vmatpush3.msra.mxu1 %v3764_v57  ;;  %4260 = vmatprep.mubr.msk.f32.mxu1 %vm739_vm1, %v2552_v19  ;;  %v3784_v19 = vld [vmem:[%s5166_s13 + $0x18] sm:$0x1f] }
 0x3da   : > { %4254 = vmatprep.subr.mxu1 %v3763_v17  ;;  %4266 = vmatpush3.msra.mxu0 %v3768_v18  ;;  %v3796_v18 = vld [vmem:[%s5166_s13 + $0x38] sm:$0x1f] }
 0x3db   : > { %4255 = vmatpush3.msra.mxu1 %v3763_v17  ;;  %4277 = vmatprep.subr.mxu0 %v4375_v26  ;;  %v3781_v17 = vld [vmem:[%s5166_s13 + $0x10] sm:$0x1f] }
 0x3dc   : > { %4256 = vmatprep.subr.mxu1 %v3762_v21 }
 0x3dd   : > { %4257 = vmatpush3.msra.mxu1 %v3762_v21 }
 0x3de   : > { %4258 = vmatprep.subr.mxu1 %v3761_v22 }
 0x3df   : > { %4259 = vmatpush3.msra.mxu1 %v3761_v22 }
 0x3e0   : > { %4261 = vmatmul.mubr.msk.f32.vlgmr.msra.gmra.mxu1 %vm739_vm1, %v2554_v23  ;;  %4270 = vmatprep.subr.mxu1 %v4375_v26  ;;  %v3790_v23 = vld [vmem:[%s5166_s13 + $0x28] sm:$0x1f] }
 0x3e1   : > { %4271 = vmatpush3.msra.mxu1 %v2661_v24  ;;  %4274 = vmatprep.mubr.msk.f32.mxu1 %vm4376_vm3, %v4375_v26 }
 0x3e2   : > { %4272 = vmatprep.subr.mxu1 %v4375_v26 }
 0x3e3   : > { %4273 = vmatpush3.msra.mxu1 %v2660_v27  ;;  %v3793_v27 = vld [vmem:[%s5166_s13 + $0x30] sm:$0x1f] }
 0x3e4   : > { %4284 = vmatprep.subr.mxu1 %v4375_v26 }
 0x495   : > { %v4251_v29 = vpop.f32.mrf.mxu0 }
 0x497   : > { %v2536_v32 = vpop.f32.mrf.mxu0 }
 0x498   : > { %v4240_v28 = vpop.f32.mrf.mxu1 }
 0x499   : > { %v2542_v31 = vadd.f32 %v4251_v29, %v4240_v28 }
 0x49a   : > { %v2457_v30 = vpop.f32.mrf.mxu1 }
 0x49b   : > { %v2537_v35 = vadd.f32 %v2536_v32, %v2457_v30 }
 0x4a0   : > { %v4262_v33 = vpop.f32.mrf.mxu1 }
 0x4a1   : > { %v2635_v36 = vadd.f32 %v4262_v33, %v2542_v31  ;;  %v2912_v31 = vld [vmem:[%s5167_s14] sm:$0x1f] }
 0x4a2   : > { %v2625_v37 = vpop.f32.mrf.mxu1 }
 0x4a3   : > { %v2644_v38 = vadd.f32 %v3767_v34, %v2635_v36  ;;  %v2634_v39 = vadd.f32 %v2625_v37, %v2537_v35 }
 0x4a5   : > { %2647 = vst.msk [vmem:[#allocation6 + $0x8] sm:$0xff] %vm2645_vm4, %v2644_v38  ;;  %v2643_v40 = vadd.f32 %v3767_v34, %v2634_v39 }
 0x4a7   : > { %2646 = vst.msk [vmem:[#allocation6] sm:$0xff] %vm2645_vm4, %v2643_v40 }
 0x4ae   : > { %v2648_v41 = vld [vmem:[#allocation6] ss:$2 sm:$0xff]  ;;  %v2650_v42 = vld [vmem:[#allocation6 + $0x1] ss:$2 sm:$0xff] }
 0x4af   : > { %v2651_v43 = vmax.f32 %v2648_v41, %v2650_v42 }
 0x4b1   : > { %v2653_v47 = vmul.f32 0.70710677, %v2651_v43  ;;  %v2652_v49 = vmul.f32 0.5, %v2651_v43 }
 0x4b3   : > { %4361 = verf.f32 %v2653_v47 }
 0x4c0   : > { %v4362_v48 = vpop.eup %4361 }
 0x4c1   : > { %v2655_v45 = vadd.f32 1.0, %v4362_v48 }
 0x4c3   : > { %v2656_v50 = vmul.f32 %v2655_v45, %v2652_v49 }
 0x4c5   : > { %2657 = vst.msk [vmem:[#allocation7 + $0x1] sm:$0xff] %vm2645_vm4, %v2656_v50 }
 0x4cc   : > { %v2658_v51 = vld [vmem:[#allocation7] sm:$0xff]  ;;  %v2659_v52 = vld [vmem:[#allocation7 + $0x8] sm:$0x3] }
 0x4cd   : > { %v2667_v53 = vrot.slane %v2658_v51, 1  ;;  %4275 = vmatmul.mubr.msk.f32.vlgmr.msra.gmra.mxu1 %vm2645_vm4, %v2658_v51  ;;  %v2668_v54 = vrot.slane %v2659_v52, 1  ;;  %v2817_v56 = vrot.slane %v2658_v51, 2  ;;  %v2818_v58 = vrot.slane %v2659_v52, 2 }
 0x4ce   : > { %4286 = vmatprep.mubr.msk.f32.mxu1 %vm4376_vm3, %v4375_v26 }
 0x4cf   : > { %v2669_v57 = vsel %vm566_vm10, %v2667_v53, %v2668_v54  ;;  %v2819_v60 = vsel %vm590_vm11, %v2817_v56, %v2818_v58 }
 0x4d0   : > { %4268 = vmatmul.mubr.msk.f32.vlgmr.msra.gmra.mxu0 %vm2645_vm4, %v2669_v57 }
 0x4d1   : > { %4278 = vmatpush3.msra.mxu0 %v3773_v55  ;;  %4281 = vmatprep.mubr.msk.f32.mxu0 %vm4376_vm3, %v4375_v26 }
 0x4d2   : > { %4279 = vmatprep.subr.mxu0 %v4375_v26 }
 0x4d3   : > { %4280 = vmatpush3.msra.mxu0 %v3772_v59 }
 0x4d4   : > { %4282 = vmatmul.mubr.msk.f32.vlgmr.msra.gmra.mxu0 %vm2645_vm4, %v2819_v60  ;;  %4289 = vmatprep.subr.mxu0 %v4375_v26 }
 0x4d5   : > { %4291 = vmatprep.mubr.msk.f32.mxu0 %vm4376_vm3, %v4375_v26 }
 0x58d   : > { %v2810_v61 = vpop.f32.mrf.mxu1 }
 0x58f   : > { %v4276_v62 = vpop.f32.mrf.mxu1 }
 0x590   : > { %v2738_v63 = vpop.f32.mrf.mxu0 }
 0x591   : > { %v2811_v0 = vadd.f32 %v2810_v61, %v2738_v63 }
 0x592   : > { %v4269_v1 = vpop.f32.mrf.mxu0 }
 0x594   : > { %v2888_v14 = vpop.f32.mrf.mxu0 }
 0x595   : > { %v2892_v44 = vadd.f32 %v2888_v14, %v2811_v0 }
 0x596   : > { %v4283_v2 = vpop.f32.mrf.mxu0 }
 0x597   : > { %v2900_v3 = vadd.f32 %v3775_v46, %v2892_v44 }
 0x599   : > { %2902 = vst.msk [vmem:[#allocation8] sm:$0xff] %vm2901_vm5, %v2900_v3 }
 0x5a0   : > { %v2903_v4 = vld [vmem:[#allocation8] ss:$2 sm:$0xf]  ;;  %v2905_v5 = vld [vmem:[#allocation8 + $0x1] ss:$2 sm:$0xf] }
 0x5a1   : > { %v2906_v16 = vmax.f32 %v2903_v4, %v2905_v5 }
 0x5a3   : > { %v2908_v6 = vmul.f32 0.70710677, %v2906_v16  ;;  %v2907_v8 = vmul.f32 0.5, %v2906_v16 }
 0x5a5   : > { %4363 = verf.f32 %v2908_v6 }
 0x5b2   : > { %v4364_v7 = vpop.eup %4363 }
 0x5b3   : > { %v2910_v9 = vadd.f32 1.0, %v4364_v7 }
 0x5b5   : > { %v2911_v10 = vmul.f32 %v2910_v9, %v2907_v8 }
 0x5b7   : > { %3074 = vrot.lane.b32.xlu0 %v2911_v10, %s4377_s21  ;;  %2994 = vrot.lane.b32.xlu1 %v2911_v10, %s4378_s22 }
 0x5b8   : > { %4285 = vmatpush3.msk.msra.mxu1 %vm638_vm13, %v2911_v10 }
 0x5b9   : > { %4294 = vmatprep.subr.mxu1 %v4375_v26  ;;  %4287 = vmatmul.mubr.msk.f32.vlgmr.msra.gmra.mxu1 %vm2914_vm6, %v2913_v11 }
 0x5ba   : > { %4296 = vmatprep.mubr.msk.f32.mxu1 %vm4376_vm3, %v4375_v26 }
 0x5bb   : > { %3234 = vrot.lane.b32.xlu0 %v2911_v10, %s4379_s23  ;;  %3154 = vrot.lane.b32.xlu1 %v2911_v10, %s4380_s24 }
 0x5bf   : > { %3394 = vrot.lane.b32.xlu0 %v2911_v10, %s4381_s25  ;;  %3314 = vrot.lane.b32.xlu1 %v2911_v10, %s4382_s26 }
 0x5c3   : > { %3474 = vrot.lane.b32.xlu1 %v2911_v10, %s4383_s27 }
 0x629   : > { %v3075_v13 = vpop.permute.xlu0 %3074  ;;  %v2995_v15 = vpop.permute.xlu1 %2994 }
 0x62a   : > { %4290 = vmatpush3.msk.msra.mxu0 %vm638_vm13, %v2995_v15  ;;  %4295 = vmatpush3.msk.msra.mxu1 %vm638_vm13, %v3075_v13 }
 0x62b   : > { %4292 = vmatmul.mubr.msk.f32.vlgmr.msra.gmra.mxu0 %vm2914_vm6, %v3778_v12  ;;  %4299 = vmatprep.subr.mxu0 %v4375_v26 }
 0x62c   : > { %4304 = vmatprep.subr.mxu1 %v4375_v26  ;;  %4297 = vmatmul.mubr.msk.f32.vlgmr.msra.gmra.mxu1 %vm2914_vm6, %v3781_v17 }
 0x62d   : > { %v3235_v21 = vpop.permute.xlu0 %3234  ;;  %v3155_v22 = vpop.permute.xlu1 %3154  ;;  %4301 = vmatprep.mubr.msk.f32.mxu0 %vm4376_vm3, %v4375_v26  ;;  %4306 = vmatprep.mubr.msk.f32.mxu1 %vm4376_vm3, %v4375_v26 }
 0x62e   : > { %4300 = vmatpush3.msk.msra.mxu0 %vm638_vm13, %v3155_v22  ;;  %4305 = vmatpush3.msk.msra.mxu1 %vm638_vm13, %v3235_v21 }
 0x62f   : > { %4302 = vmatmul.mubr.msk.f32.vlgmr.msra.gmra.mxu0 %vm2914_vm6, %v3784_v19  ;;  %4309 = vmatprep.subr.mxu0 %v4375_v26 }
 0x630   : > { %4314 = vmatprep.subr.mxu1 %v4375_v26  ;;  %4307 = vmatmul.mubr.msk.f32.vlgmr.msra.gmra.mxu1 %vm2914_vm6, %v3787_v20 }
 0x631   : > { %v3395_v24 = vpop.permute.xlu0 %3394  ;;  %v3315_v25 = vpop.permute.xlu1 %3314  ;;  %4311 = vmatprep.mubr.msk.f32.mxu0 %vm4376_vm3, %v4375_v26  ;;  %4316 = vmatprep.mubr.msk.f32.mxu1 %vm4376_vm3, %v4375_v26 }
 0x632   : > { %4310 = vmatpush3.msk.msra.mxu0 %vm638_vm13, %v3315_v25  ;;  %4315 = vmatpush3.msk.msra.mxu1 %vm638_vm13, %v3395_v24 }
 0x633   : > { %4312 = vmatmul.mubr.msk.f32.vlgmr.msra.gmra.mxu0 %vm2914_vm6, %v3790_v23  ;;  %4319 = vmatprep.subr.mxu0 %v4375_v26 }
 0x634   : > { %4317 = vmatmul.mubr.msk.f32.vlgmr.msra.gmra.mxu1 %vm2914_vm6, %v3793_v27  ;;  %4321 = vmatprep.mubr.msk.f32.mxu0 %vm4376_vm3, %v4375_v26 }
 0x635   : > { %v3475_v28 = vpop.permute.xlu1 %3474 }
 0x636   : > { %4320 = vmatpush3.msk.msra.mxu0 %vm638_vm13, %v3475_v28 }
 0x637   : > { %4322 = vmatmul.mubr.msk.f32.vlgmr.msra.gmra.mxu0 %vm2914_vm6, %v3796_v18 }
 0x679   : > { %v2987_v29 = vpop.f32.mrf.mxu1 }
 0x67a   : > { %v2991_v32 = vadd.f32 %v2987_v29, %v2912_v31 }
 0x67b   : > { %v4288_v30 = vpop.f32.mrf.mxu1 }
 0x6eb   : > { %v3067_v33 = vpop.f32.mrf.mxu0 }
 0x6ec   : > { %v3071_v34 = vadd.f32 %v3067_v33, %v2991_v32  ;;  %v3147_v35 = vpop.f32.mrf.mxu1 }
 0x6ed   : > { %v4293_v26 = vpop.f32.mrf.mxu0 }
 0x6ee   : > { %v3151_v36 = vadd.f32 %v3147_v35, %v3071_v34  ;;  %v4298_v37 = vpop.f32.mrf.mxu1 }
 0x6ef   : > { %v3227_v38 = vpop.f32.mrf.mxu0 }
 0x6f0   : > { %v3231_v39 = vadd.f32 %v3227_v38, %v3151_v36  ;;  %v3307_v40 = vpop.f32.mrf.mxu1 }
 0x6f1   : > { %v4303_v41 = vpop.f32.mrf.mxu0 }
 0x6f2   : > { %v3311_v42 = vadd.f32 %v3307_v40, %v3231_v39  ;;  %v4308_v43 = vpop.f32.mrf.mxu1 }
 0x6f3   : > { %v3387_v47 = vpop.f32.mrf.mxu0 }
 0x6f4   : > { %v3391_v48 = vadd.f32 %v3387_v47, %v3311_v42  ;;  %v3467_v49 = vpop.f32.mrf.mxu1 }
 0x6f5   : > { %v4313_v45 = vpop.f32.mrf.mxu0 }
 0x6f6   : > { %v3471_v50 = vadd.f32 %v3467_v49, %v3391_v48  ;;  %v4318_v51 = vpop.f32.mrf.mxu1 }
 0x6f7   : > { %v3547_v52 = vpop.f32.mrf.mxu0 }
 0x6f8   : > { %v3551_v53 = vadd.f32 %v3547_v52, %v3471_v50 }
 0x6f9   : > { %v4323_v54 = vpop.f32.mrf.mxu0 }
 0x6fa   : > { %3553 = vst.msk [vmem:[%s4480_s28] sm:$0x1f] %vm3552_vm7, %v3551_v53 }
 0x6fb PF: > { %s25_s18 = sadd.s32 1, %s4371_s18  }
 0x6fc   : > { %p22_p5 = scmp.ge.s32.totalorder %s25_s18, 4  }
 0x6fe   :  { %24 = sbr.rel (!%p22_p5) target bundleno = 1 (0x1), region = 148 }

</bundles_post_ra>
